<compile_context>
chip_gen: v5e
topology: v5e:2x2
jax: 0.10.0
libtpu: 0.0.40
codegen_flags: <defaults>
</compile_context>

<pallas_src>
import jax
import jax.numpy as jnp
from jax import lax
from jax.experimental import pallas as pl
from jax.experimental.pallas import tpu as pltpu

# ---------------- config (small, consistent with QWenConfig fields) ----------
VOCAB_SIZE   = 128
VOCAB_PADDED = (VOCAB_SIZE + 63) // 64 * 64        # 128
N_EMBD       = 64
NUM_HEADS    = 4
HEAD_DIM     = N_EMBD // NUM_HEADS                 # 16
HALF_DIM     = HEAD_DIM // 2                       # 8
FFN_HIDDEN   = 256                                 # config.ffn_hidden_size
INTERMEDIATE = FFN_HIDDEN // 2                     # QWenMLP intermediate = 128
NUM_LAYERS   = 2
EPS          = 1e-6
SEQ_LEN      = 8
ROPE_BASE    = 10000.0


# ------------------------------ fused Pallas kernel --------------------------
def _qwen_forward_kernel(
    ids_ref,                       # SMEM [T] int32
    cos_q_ref, sin_q_ref,          # VMEM [T, Dh] f32 (1/sqrt(Dh) folded in)
    cos_k_ref, sin_k_ref,          # VMEM [T, Dh] f32 (signed sin)
    bias_ref,                      # VMEM [T, T]  f32 additive causal bias
    wte_ref,                       # VMEM [Vp, D] f32
    ln1_ref,                       # VMEM [L, 1, D]   f32
    attn_w_ref,                    # VMEM [L, D, 3D]  bf16
    attn_b_ref,                    # VMEM [L, 1, 3D]  f32
    cproj_ref,                     # VMEM [L, D, D]   bf16
    ln2_ref,                       # VMEM [L, 1, D]   f32
    gate_up_ref,                   # VMEM [L, D, 2I]  bf16
    mlp_proj_ref,                  # VMEM [L, I, D]   bf16
    lnf_ref,                       # VMEM [1, D]      f32
    lm_head_ref,                   # VMEM [D, Vp]     bf16
    logits_ref,                    # OUT  [T, Vp]     f32
):
    f32, bf16 = jnp.float32, jnp.bfloat16
    T = logits_ref.shape[0]

    def rms(x, w):                                   # x:[T,D] f32, w:[1,D]
        var = jnp.mean(x * x, axis=-1, keepdims=True)
        return x * lax.rsqrt(var + EPS) * w

    def rope(x, cos, sin_signed):
        # rotate_half(x) == concat(-x[half:], x[:half]); the minus sign lives
        # in sin_signed = concat(-sin, sin), so this is a true rotation.
        # TODO(synk): at real Dh (>=128) use pltpu.roll(x, HALF_DIM, axis=-1)
        #             so the swap rides the XLU slot under the MXU matmuls.
        swapped = jnp.concatenate([x[..., HALF_DIM:], x[..., :HALF_DIM]], axis=-1)
        return x * cos + swapped * sin_signed

    # --- token embedding: SMEM-scalar-indexed row gather (no one-hot MXU) ----
    rows = [wte_ref[pl.ds(ids_ref[i], 1), :] for i in range(T)]   # T x [1, D]
    h = jnp.concatenate(rows, axis=0).astype(f32)                 # [T, D]

    bias  = bias_ref[...]                                         # [T, T]
    cos_q = cos_q_ref[...]; sin_q = sin_q_ref[...]                # [T, Dh]
    cos_k = cos_k_ref[...]; sin_k = sin_k_ref[...]

    # TODO(synk): at real dims this Python layer loop becomes a grid axis
    #             ("arbitrary") with per-layer weight BlockSpecs.
    for l in range(NUM_LAYERS):
        # ------------------------- attention block -------------------------
        x = rms(h, ln1_ref[l])                                    # [T, D]
        qkv = jnp.dot(x.astype(bf16), attn_w_ref[l],
                      preferred_element_type=f32) + attn_b_ref[l]  # [T, 3D]
        q = qkv[:, :N_EMBD]
        k = qkv[:, N_EMBD:2 * N_EMBD]
        v = qkv[:, 2 * N_EMBD:]

        # head-batched views [H, T, Dh]
        q3 = jnp.swapaxes(q.reshape(T, NUM_HEADS, HEAD_DIM), 0, 1)
        k3 = jnp.swapaxes(k.reshape(T, NUM_HEADS, HEAD_DIM), 0, 1)
        v3 = jnp.swapaxes(v.reshape(T, NUM_HEADS, HEAD_DIM), 0, 1)

        q3 = rope(q3, cos_q, sin_q)          # attention scale folded into tables
        k3 = rope(k3, cos_k, sin_k)

        s = jnp.einsum('hqd,hkd->hqk', q3.astype(bf16), k3.astype(bf16),
                       preferred_element_type=f32)                # [H, T, T]
        s = s + bias                                              # causal bias
        p = jnp.exp(s - jnp.max(s, axis=-1, keepdims=True))
        # NOTE(synk): approx=True ~1e-3 rel err; use exact divide when
        # validating against a reference softmax.
        p = p * pl.reciprocal(jnp.sum(p, axis=-1, keepdims=True), approx=True)
        o3 = jnp.einsum('hqk,hkd->hqd', p.astype(bf16), v3.astype(bf16),
                        preferred_element_type=f32)               # [H, T, Dh]
        attn = jnp.swapaxes(o3, 0, 1).reshape(T, N_EMBD)          # [T, D]
        h = h + jnp.dot(attn.astype(bf16), cproj_ref[l],
                        preferred_element_type=f32)               # fused residual

        # ---------------------------- MLP block -----------------------------
        x = rms(h, ln2_ref[l])
        gu = jnp.dot(x.astype(bf16), gate_up_ref[l],
                     preferred_element_type=f32)                  # [T, 2I]
        gate = gu[:, :INTERMEDIATE]
        up = gu[:, INTERMEDIATE:]
        act = gate * lax.logistic(gate) * up                      # SiLU * Mul (f32)
        h = h + jnp.dot(act.astype(bf16), mlp_proj_ref[l],
                        preferred_element_type=f32)

    # --------------------------- final norm + lm_head -----------------------
    # TODO(synk): at real vocab (151936) tile lm_head over vocab with a
    #             lane-dense out_spec and stream columns from HBM.
    h = rms(h, lnf_ref[...])
    logits_ref[...] = jnp.dot(h.astype(bf16), lm_head_ref[...],
                              preferred_element_type=f32).astype(logits_ref.dtype)


# ------------------------------ JAX wrapper -----------------------------------
def qwen_forward(params, input_ids, positions):
    T = input_ids.shape[0]
    scale = HEAD_DIM ** -0.5

    # position-only RoPE tables (GPT-NeoX style), computed ONCE in the wrapper.
    inv_freq = 1.0 / (ROPE_BASE ** (jnp.arange(0, HALF_DIM, dtype=jnp.float32)
                                    / HALF_DIM))
    freqs = positions.astype(jnp.float32)[:, None] * inv_freq[None, :]   # [T, h]
    cos = jnp.cos(freqs)
    sin = jnp.sin(freqs)
    cos_k = jnp.concatenate([cos, cos], axis=-1)                  # [T, Dh]
    sin_k = jnp.concatenate([-sin, sin], axis=-1)                 # signed sin
    cos_q = cos_k * scale                                         # fold 1/sqrt(Dh)
    sin_q = sin_k * scale

    # additive causal bias, built once (0 where allowed, -1e30 where masked)
    r = jnp.arange(T, dtype=jnp.int32)
    bias = jnp.where(r[None, :] <= r[:, None], 0.0, -1e30).astype(jnp.float32)

    ids = input_ids.astype(jnp.int32)                             # [T] -> SMEM

    operands = (
        ids, cos_q, sin_q, cos_k, sin_k, bias,
        params["wte"],
        params["ln1"], params["c_attn_w"], params["c_attn_b"], params["c_proj_w"],
        params["ln2"], params["gate_up_w"], params["mlp_c_proj_w"],
        params["ln_f"], params["lm_head"],
    )

    # advisory cost estimate for XLA's scheduler around the fused call
    D, I = N_EMBD, INTERMEDIATE
    per_layer_flops = (2 * T * D * 3 * D            # qkv
                       + 2 * 2 * NUM_HEADS * T * T * HEAD_DIM   # scores + pv
                       + 2 * T * D * D              # c_proj
                       + 2 * T * D * 2 * I          # gate_up
                       + 2 * T * I * D)             # mlp c_proj
    flops = NUM_LAYERS * per_layer_flops + 2 * T * D * VOCAB_PADDED
    transcendentals = NUM_LAYERS * (NUM_HEADS * T * T + T * I + 2 * T) + T
    bytes_accessed = (sum(int(o.size) * o.dtype.itemsize for o in operands)
                      + T * VOCAB_PADDED * 4)

    vmem = pl.BlockSpec(memory_space=pltpu.MemorySpace.VMEM)
    smem = pl.BlockSpec(memory_space=pltpu.MemorySpace.SMEM)

    logits = pl.pallas_call(
        _qwen_forward_kernel,
        out_shape=jax.ShapeDtypeStruct((T, VOCAB_PADDED), jnp.float32),
        in_specs=[smem] + [vmem] * (len(operands) - 1),
        out_specs=vmem,
        cost_estimate=pl.CostEstimate(flops=flops,
                                      transcendentals=transcendentals,
                                      bytes_accessed=bytes_accessed),
        compiler_params=pltpu.CompilerParams(vmem_limit_bytes=32 * 1024 * 1024),
    )(*operands)

    logits = logits[:, :VOCAB_SIZE]
    next_token = jnp.argmax(logits[-1], axis=-1)   # greedy "sampler"
    return next_token, logits


# ------------------------------ params ----------------------------------------
def init_params(key):
    def nrm(k, shape, dtype=jnp.bfloat16, scale=0.02):
        w = scale * jax.random.normal(k, shape, dtype=jnp.float32)
        return w.astype(dtype)

    keys = jax.random.split(key, 7)
    return {
        # wte stays f32 (row-gathered with a dynamic sublane slice)
        "wte":          nrm(keys[0], (VOCAB_PADDED, N_EMBD), jnp.float32),
        "lm_head":      nrm(keys[1], (N_EMBD, VOCAB_PADDED)),          # bf16, [D_in, V]
        "ln_f":         jnp.ones((1, N_EMBD), jnp.float32),
        # per-layer weights stacked on a leading layer axis (all VMEM-resident)
        "ln1":          jnp.ones((NUM_LAYERS, 1, N_EMBD), jnp.float32),
        "ln2":          jnp.ones((NUM_LAYERS, 1, N_EMBD), jnp.float32),
        "c_attn_w":     nrm(keys[2], (NUM_LAYERS, N_EMBD, 3 * N_EMBD)),
        "c_attn_b":     nrm(keys[3], (NUM_LAYERS, 1, 3 * N_EMBD), jnp.float32),
        "c_proj_w":     nrm(keys[4], (NUM_LAYERS, N_EMBD, N_EMBD)),
        "gate_up_w":    nrm(keys[5], (NUM_LAYERS, N_EMBD, 2 * INTERMEDIATE)),
        "mlp_c_proj_w": nrm(keys[6], (NUM_LAYERS, INTERMEDIATE, N_EMBD)),
    }


# ------------------------------ main -------------------------------------------
if __name__ == "__main__":
    root = jax.random.PRNGKey(0)
    pkey, ikey = jax.random.split(root)
    params = init_params(pkey)

    input_ids = jax.random.randint(ikey, (SEQ_LEN,), 0, VOCAB_SIZE, dtype=jnp.int32)
    positions = jnp.arange(SEQ_LEN, dtype=jnp.int32)

    fwd = jax.jit(qwen_forward)
    next_token, logits = fwd(params, input_ids, positions)
    jax.block_until_ready((next_token, logits))

    assert logits.shape == (SEQ_LEN, VOCAB_SIZE)
    assert next_token.shape == ()
    assert bool(jnp.all(jnp.isfinite(logits)))
    print("KERNEL_OK")
</pallas_src>

<mosaic_0001>
module attributes {stable_mosaic.version = 11 : i64} {
  func.func @_qwen_forward_kernel(%arg0: memref<8xi32, #tpu.memory_space<smem>>, %arg1: memref<8x16xf32, #tpu.memory_space<vmem>>, %arg2: memref<8x16xf32, #tpu.memory_space<vmem>>, %arg3: memref<8x16xf32, #tpu.memory_space<vmem>>, %arg4: memref<8x16xf32, #tpu.memory_space<vmem>>, %arg5: memref<8x8xf32, #tpu.memory_space<vmem>>, %arg6: memref<128x64xf32, #tpu.memory_space<vmem>>, %arg7: memref<2x1x64xf32, #tpu.memory_space<vmem>>, %arg8: memref<2x64x192xbf16, #tpu.memory_space<vmem>>, %arg9: memref<2x1x192xf32, #tpu.memory_space<vmem>>, %arg10: memref<2x64x64xbf16, #tpu.memory_space<vmem>>, %arg11: memref<2x1x64xf32, #tpu.memory_space<vmem>>, %arg12: memref<2x64x256xbf16, #tpu.memory_space<vmem>>, %arg13: memref<2x128x64xbf16, #tpu.memory_space<vmem>>, %arg14: memref<1x64xf32, #tpu.memory_space<vmem>>, %arg15: memref<64x128xbf16, #tpu.memory_space<vmem>>, %arg16: memref<8x128xf32, #tpu.memory_space<vmem>>) attributes {dimension_semantics = [], scalar_prefetch = 0 : i64, scratch_operands = 0 : i64, tpu.core_type = #tpu.core_type<tc>} {
    %c0 = arith.constant 0 : index
    %0 = memref.load %arg0[%c0] : memref<8xi32, #tpu.memory_space<smem>>
    %1 = arith.index_cast %0 : i32 to index
    %c0_0 = arith.constant 0 : index
    %2 = vector.load %arg6[%1, %c0_0] : memref<128x64xf32, #tpu.memory_space<vmem>>, vector<1x64xf32>
    %c1 = arith.constant 1 : index
    %3 = memref.load %arg0[%c1] : memref<8xi32, #tpu.memory_space<smem>>
    %4 = arith.index_cast %3 : i32 to index
    %c0_1 = arith.constant 0 : index
    %5 = vector.load %arg6[%4, %c0_1] : memref<128x64xf32, #tpu.memory_space<vmem>>, vector<1x64xf32>
    %c2 = arith.constant 2 : index
    %6 = memref.load %arg0[%c2] : memref<8xi32, #tpu.memory_space<smem>>
    %7 = arith.index_cast %6 : i32 to index
    %c0_2 = arith.constant 0 : index
    %8 = vector.load %arg6[%7, %c0_2] : memref<128x64xf32, #tpu.memory_space<vmem>>, vector<1x64xf32>
    %c3 = arith.constant 3 : index
    %9 = memref.load %arg0[%c3] : memref<8xi32, #tpu.memory_space<smem>>
    %10 = arith.index_cast %9 : i32 to index
    %c0_3 = arith.constant 0 : index
    %11 = vector.load %arg6[%10, %c0_3] : memref<128x64xf32, #tpu.memory_space<vmem>>, vector<1x64xf32>
    %c4 = arith.constant 4 : index
    %12 = memref.load %arg0[%c4] : memref<8xi32, #tpu.memory_space<smem>>
    %13 = arith.index_cast %12 : i32 to index
    %c0_4 = arith.constant 0 : index
    %14 = vector.load %arg6[%13, %c0_4] : memref<128x64xf32, #tpu.memory_space<vmem>>, vector<1x64xf32>
    %c5 = arith.constant 5 : index
    %15 = memref.load %arg0[%c5] : memref<8xi32, #tpu.memory_space<smem>>
    %16 = arith.index_cast %15 : i32 to index
    %c0_5 = arith.constant 0 : index
    %17 = vector.load %arg6[%16, %c0_5] : memref<128x64xf32, #tpu.memory_space<vmem>>, vector<1x64xf32>
    %c6 = arith.constant 6 : index
    %18 = memref.load %arg0[%c6] : memref<8xi32, #tpu.memory_space<smem>>
    %19 = arith.index_cast %18 : i32 to index
    %c0_6 = arith.constant 0 : index
    %20 = vector.load %arg6[%19, %c0_6] : memref<128x64xf32, #tpu.memory_space<vmem>>, vector<1x64xf32>
    %c7 = arith.constant 7 : index
    %21 = memref.load %arg0[%c7] : memref<8xi32, #tpu.memory_space<smem>>
    %22 = arith.index_cast %21 : i32 to index
    %c0_7 = arith.constant 0 : index
    %23 = vector.load %arg6[%22, %c0_7] : memref<128x64xf32, #tpu.memory_space<vmem>>, vector<1x64xf32>
    %24 = tpu.concatenate %2, %5, %8, %11, %14, %17, %20, %23 in 0 : vector<1x64xf32>, vector<1x64xf32>, vector<1x64xf32>, vector<1x64xf32>, vector<1x64xf32>, vector<1x64xf32>, vector<1x64xf32>, vector<1x64xf32> -> vector<8x64xf32>
    %c0_8 = arith.constant 0 : index
    %c0_9 = arith.constant 0 : index
    %25 = vector.load %arg5[%c0_8, %c0_9] : memref<8x8xf32, #tpu.memory_space<vmem>>, vector<8x8xf32>
    %c0_10 = arith.constant 0 : index
    %c0_11 = arith.constant 0 : index
    %26 = vector.load %arg1[%c0_10, %c0_11] : memref<8x16xf32, #tpu.memory_space<vmem>>, vector<8x16xf32>
    %c0_12 = arith.constant 0 : index
    %c0_13 = arith.constant 0 : index
    %27 = vector.load %arg2[%c0_12, %c0_13] : memref<8x16xf32, #tpu.memory_space<vmem>>, vector<8x16xf32>
    %c0_14 = arith.constant 0 : index
    %c0_15 = arith.constant 0 : index
    %28 = vector.load %arg3[%c0_14, %c0_15] : memref<8x16xf32, #tpu.memory_space<vmem>>, vector<8x16xf32>
    %c0_16 = arith.constant 0 : index
    %c0_17 = arith.constant 0 : index
    %29 = vector.load %arg4[%c0_16, %c0_17] : memref<8x16xf32, #tpu.memory_space<vmem>>, vector<8x16xf32>
    %c0_18 = arith.constant 0 : index
    %c0_19 = arith.constant 0 : index
    %c0_20 = arith.constant 0 : index
    %30 = vector.load %arg7[%c0_18, %c0_19, %c0_20] : memref<2x1x64xf32, #tpu.memory_space<vmem>>, vector<1x1x64xf32>
    %31 = vector.shape_cast %30 : vector<1x1x64xf32> to vector<1x64xf32>
    %32 = arith.mulf %24, %24 : vector<8x64xf32>
    %cst = arith.constant dense<0.000000e+00> : vector<8xf32>
    %33 = vector.multi_reduction <add>, %32, %cst [1] : vector<8x64xf32> to vector<8xf32>
    %34 = vector.shape_cast %33 : vector<8xf32> to vector<8x1xf32>
    %cst_21 = arith.constant 6.400000e+01 : f32
    %35 = vector.broadcast %cst_21 : f32 to vector<8x1xf32>
    %36 = arith.divf %34, %35 : vector<8x1xf32>
    %cst_22 = arith.constant 9.99999997E-7 : f32
    %37 = vector.broadcast %cst_22 : f32 to vector<8x1xf32>
    %38 = arith.addf %36, %37 : vector<8x1xf32>
    %39 = math.rsqrt %38 : vector<8x1xf32>
    %40 = vector.broadcast %39 : vector<8x1xf32> to vector<8x64xf32>
    %41 = arith.mulf %24, %40 : vector<8x64xf32>
    %42 = vector.broadcast %31 : vector<1x64xf32> to vector<8x64xf32>
    %43 = arith.mulf %41, %42 : vector<8x64xf32>
    %44 = arith.truncf %43 : vector<8x64xf32> to vector<8x64xbf16>
    %c0_23 = arith.constant 0 : index
    %c0_24 = arith.constant 0 : index
    %c0_25 = arith.constant 0 : index
    %45 = vector.load %arg8[%c0_23, %c0_24, %c0_25] : memref<2x64x192xbf16, #tpu.memory_space<vmem>>, vector<1x64x192xbf16>
    %46 = vector.shape_cast %45 : vector<1x64x192xbf16> to vector<64x192xbf16>
    %cst_26 = arith.constant dense<0.000000e+00> : vector<8x192xf32>
    %47 = tpu.matmul %44, %46, %cst_26 {dimension_numbers = #tpu.dot_dimension_numbers<[1], [0], [0], [1], [0, 0, 1, 1], [], []>} : vector<8x64xbf16>, vector<64x192xbf16>, vector<8x192xf32> -> vector<8x192xf32>
    %c0_27 = arith.constant 0 : index
    %c0_28 = arith.constant 0 : index
    %c0_29 = arith.constant 0 : index
    %48 = vector.load %arg9[%c0_27, %c0_28, %c0_29] : memref<2x1x192xf32, #tpu.memory_space<vmem>>, vector<1x1x192xf32>
    %49 = vector.shape_cast %48 : vector<1x1x192xf32> to vector<1x192xf32>
    %50 = vector.broadcast %49 : vector<1x192xf32> to vector<8x192xf32>
    %51 = arith.addf %47, %50 : vector<8x192xf32>
    %52 = vector.extract_strided_slice %51 {offsets = [0, 0], sizes = [8, 64], strides = [1, 1]} : vector<8x192xf32> to vector<8x64xf32>
    %53 = vector.extract_strided_slice %51 {offsets = [0, 64], sizes = [8, 64], strides = [1, 1]} : vector<8x192xf32> to vector<8x64xf32>
    %54 = vector.extract_strided_slice %51 {offsets = [0, 128], sizes = [8, 64], strides = [1, 1]} : vector<8x192xf32> to vector<8x64xf32>
    %55 = vector.shape_cast %52 : vector<8x64xf32> to vector<8x4x16xf32>
    %56 = tpu.transpose %55, [1, 0, 2] : vector<8x4x16xf32> -> vector<4x8x16xf32>
    %57 = vector.shape_cast %53 : vector<8x64xf32> to vector<8x4x16xf32>
    %58 = tpu.transpose %57, [1, 0, 2] : vector<8x4x16xf32> -> vector<4x8x16xf32>
    %59 = vector.shape_cast %54 : vector<8x64xf32> to vector<8x4x16xf32>
    %60 = tpu.transpose %59, [1, 0, 2] : vector<8x4x16xf32> -> vector<4x8x16xf32>
    %61 = vector.extract_strided_slice %56 {offsets = [0, 0, 8], sizes = [4, 8, 8], strides = [1, 1, 1]} : vector<4x8x16xf32> to vector<4x8x8xf32>
    %62 = vector.extract_strided_slice %56 {offsets = [0, 0, 0], sizes = [4, 8, 8], strides = [1, 1, 1]} : vector<4x8x16xf32> to vector<4x8x8xf32>
    %63 = tpu.concatenate %61, %62 in 2 : vector<4x8x8xf32>, vector<4x8x8xf32> -> vector<4x8x16xf32>
    %64 = vector.shape_cast %26 : vector<8x16xf32> to vector<1x8x16xf32>
    %65 = vector.broadcast %64 : vector<1x8x16xf32> to vector<4x8x16xf32>
    %66 = arith.mulf %56, %65 : vector<4x8x16xf32>
    %67 = vector.shape_cast %27 : vector<8x16xf32> to vector<1x8x16xf32>
    %68 = vector.broadcast %67 : vector<1x8x16xf32> to vector<4x8x16xf32>
    %69 = arith.mulf %63, %68 : vector<4x8x16xf32>
    %70 = arith.addf %66, %69 : vector<4x8x16xf32>
    %71 = vector.extract_strided_slice %58 {offsets = [0, 0, 8], sizes = [4, 8, 8], strides = [1, 1, 1]} : vector<4x8x16xf32> to vector<4x8x8xf32>
    %72 = vector.extract_strided_slice %58 {offsets = [0, 0, 0], sizes = [4, 8, 8], strides = [1, 1, 1]} : vector<4x8x16xf32> to vector<4x8x8xf32>
    %73 = tpu.concatenate %71, %72 in 2 : vector<4x8x8xf32>, vector<4x8x8xf32> -> vector<4x8x16xf32>
    %74 = vector.shape_cast %28 : vector<8x16xf32> to vector<1x8x16xf32>
    %75 = vector.broadcast %74 : vector<1x8x16xf32> to vector<4x8x16xf32>
    %76 = arith.mulf %58, %75 : vector<4x8x16xf32>
    %77 = vector.shape_cast %29 : vector<8x16xf32> to vector<1x8x16xf32>
    %78 = vector.broadcast %77 : vector<1x8x16xf32> to vector<4x8x16xf32>
    %79 = arith.mulf %73, %78 : vector<4x8x16xf32>
    %80 = arith.addf %76, %79 : vector<4x8x16xf32>
    %81 = arith.truncf %70 : vector<4x8x16xf32> to vector<4x8x16xbf16>
    %82 = arith.truncf %80 : vector<4x8x16xf32> to vector<4x8x16xbf16>
    "tpu.trace_start"() <{level = 10 : i32, message = "hqd,hkd->hqk"}> : () -> ()
    %cst_30 = arith.constant dense<0.000000e+00> : vector<4x8x8xf32>
    %83 = tpu.matmul %81, %82, %cst_30 {dimension_numbers = #tpu.dot_dimension_numbers<[2], [2], [1], [1], [0, 0, 0, 1, 1, 1], [0], [0]>} : vector<4x8x16xbf16>, vector<4x8x16xbf16>, vector<4x8x8xf32> -> vector<4x8x8xf32>
    "tpu.trace_stop"() : () -> ()
    %84 = vector.shape_cast %25 : vector<8x8xf32> to vector<1x8x8xf32>
    %85 = vector.broadcast %84 : vector<1x8x8xf32> to vector<4x8x8xf32>
    %86 = arith.addf %83, %85 : vector<4x8x8xf32>
    %cst_31 = arith.constant dense<0xFF800000> : vector<4x8xf32>
    %87 = vector.multi_reduction <maximumf>, %86, %cst_31 [2] : vector<4x8x8xf32> to vector<4x8xf32>
    %88 = vector.shape_cast %87 : vector<4x8xf32> to vector<4x8x1xf32>
    %89 = vector.broadcast %88 : vector<4x8x1xf32> to vector<4x8x8xf32>
    %90 = arith.subf %86, %89 : vector<4x8x8xf32>
    %91 = math.exp %90 : vector<4x8x8xf32>
    %cst_32 = arith.constant dense<0.000000e+00> : vector<4x8xf32>
    %92 = vector.multi_reduction <add>, %91, %cst_32 [2] : vector<4x8x8xf32> to vector<4x8xf32>
    %93 = vector.shape_cast %92 : vector<4x8xf32> to vector<4x8x1xf32>
    %94 = tpu.reciprocal %93 {approx = true} : vector<4x8x1xf32> -> vector<4x8x1xf32>
    %95 = vector.broadcast %94 : vector<4x8x1xf32> to vector<4x8x8xf32>
    %96 = arith.mulf %91, %95 : vector<4x8x8xf32>
    %97 = arith.truncf %96 : vector<4x8x8xf32> to vector<4x8x8xbf16>
    %98 = arith.truncf %60 : vector<4x8x16xf32> to vector<4x8x16xbf16>
    "tpu.trace_start"() <{level = 10 : i32, message = "hqk,hkd->hqd"}> : () -> ()
    %cst_33 = arith.constant dense<0.000000e+00> : vector<4x8x16xf32>
    %99 = tpu.matmul %97, %98, %cst_33 {dimension_numbers = #tpu.dot_dimension_numbers<[2], [1], [1], [2], [0, 0, 0, 1, 1, 2], [0], [0]>} : vector<4x8x8xbf16>, vector<4x8x16xbf16>, vector<4x8x16xf32> -> vector<4x8x16xf32>
    "tpu.trace_stop"() : () -> ()
    %100 = tpu.transpose %99, [1, 0, 2] : vector<4x8x16xf32> -> vector<8x4x16xf32>
    %101 = vector.shape_cast %100 : vector<8x4x16xf32> to vector<8x64xf32>
    %102 = arith.truncf %101 : vector<8x64xf32> to vector<8x64xbf16>
    %c0_34 = arith.constant 0 : index
    %c0_35 = arith.constant 0 : index
    %c0_36 = arith.constant 0 : index
    %103 = vector.load %arg10[%c0_34, %c0_35, %c0_36] : memref<2x64x64xbf16, #tpu.memory_space<vmem>>, vector<1x64x64xbf16>
    %104 = vector.shape_cast %103 : vector<1x64x64xbf16> to vector<64x64xbf16>
    %cst_37 = arith.constant dense<0.000000e+00> : vector<8x64xf32>
    %105 = tpu.matmul %102, %104, %cst_37 {dimension_numbers = #tpu.dot_dimension_numbers<[1], [0], [0], [1], [0, 0, 1, 1], [], []>} : vector<8x64xbf16>, vector<64x64xbf16>, vector<8x64xf32> -> vector<8x64xf32>
    %106 = arith.addf %24, %105 : vector<8x64xf32>
    %c0_38 = arith.constant 0 : index
    %c0_39 = arith.constant 0 : index
    %c0_40 = arith.constant 0 : index
    %107 = vector.load %arg11[%c0_38, %c0_39, %c0_40] : memref<2x1x64xf32, #tpu.memory_space<vmem>>, vector<1x1x64xf32>
    %108 = vector.shape_cast %107 : vector<1x1x64xf32> to vector<1x64xf32>
    %109 = arith.mulf %106, %106 : vector<8x64xf32>
    %cst_41 = arith.constant dense<0.000000e+00> : vector<8xf32>
    %110 = vector.multi_reduction <add>, %109, %cst_41 [1] : vector<8x64xf32> to vector<8xf32>
    %111 = vector.shape_cast %110 : vector<8xf32> to vector<8x1xf32>
    %cst_42 = arith.constant 6.400000e+01 : f32
    %112 = vector.broadcast %cst_42 : f32 to vector<8x1xf32>
    %113 = arith.divf %111, %112 : vector<8x1xf32>
    %cst_43 = arith.constant 9.99999997E-7 : f32
    %114 = vector.broadcast %cst_43 : f32 to vector<8x1xf32>
    %115 = arith.addf %113, %114 : vector<8x1xf32>
    %116 = math.rsqrt %115 : vector<8x1xf32>
    %117 = vector.broadcast %116 : vector<8x1xf32> to vector<8x64xf32>
    %118 = arith.mulf %106, %117 : vector<8x64xf32>
    %119 = vector.broadcast %108 : vector<1x64xf32> to vector<8x64xf32>
    %120 = arith.mulf %118, %119 : vector<8x64xf32>
    %121 = arith.truncf %120 : vector<8x64xf32> to vector<8x64xbf16>
    %c0_44 = arith.constant 0 : index
    %c0_45 = arith.constant 0 : index
    %c0_46 = arith.constant 0 : index
    %122 = vector.load %arg12[%c0_44, %c0_45, %c0_46] : memref<2x64x256xbf16, #tpu.memory_space<vmem>>, vector<1x64x256xbf16>
    %123 = vector.shape_cast %122 : vector<1x64x256xbf16> to vector<64x256xbf16>
    %cst_47 = arith.constant dense<0.000000e+00> : vector<8x256xf32>
    %124 = tpu.matmul %121, %123, %cst_47 {dimension_numbers = #tpu.dot_dimension_numbers<[1], [0], [0], [1], [0, 0, 1, 1], [], []>} : vector<8x64xbf16>, vector<64x256xbf16>, vector<8x256xf32> -> vector<8x256xf32>
    %125 = vector.extract_strided_slice %124 {offsets = [0, 0], sizes = [8, 128], strides = [1, 1]} : vector<8x256xf32> to vector<8x128xf32>
    %126 = vector.extract_strided_slice %124 {offsets = [0, 128], sizes = [8, 128], strides = [1, 1]} : vector<8x256xf32> to vector<8x128xf32>
    %127 = arith.negf %125 : vector<8x128xf32>
    %128 = math.exp %127 : vector<8x128xf32>
    %cst_48 = arith.constant 1.000000e+00 : f32
    %129 = vector.broadcast %cst_48 : f32 to vector<8x128xf32>
    %130 = arith.addf %129, %128 : vector<8x128xf32>
    %131 = arith.divf %129, %130 : vector<8x128xf32>
    %132 = arith.mulf %125, %131 : vector<8x128xf32>
    %133 = arith.mulf %132, %126 : vector<8x128xf32>
    %134 = arith.truncf %133 : vector<8x128xf32> to vector<8x128xbf16>
    %c0_49 = arith.constant 0 : index
    %c0_50 = arith.constant 0 : index
    %c0_51 = arith.constant 0 : index
    %135 = vector.load %arg13[%c0_49, %c0_50, %c0_51] : memref<2x128x64xbf16, #tpu.memory_space<vmem>>, vector<1x128x64xbf16>
    %136 = vector.shape_cast %135 : vector<1x128x64xbf16> to vector<128x64xbf16>
    %cst_52 = arith.constant dense<0.000000e+00> : vector<8x64xf32>
    %137 = tpu.matmul %134, %136, %cst_52 {dimension_numbers = #tpu.dot_dimension_numbers<[1], [0], [0], [1], [0, 0, 1, 1], [], []>} : vector<8x128xbf16>, vector<128x64xbf16>, vector<8x64xf32> -> vector<8x64xf32>
    %138 = arith.addf %106, %137 : vector<8x64xf32>
    %c1_53 = arith.constant 1 : index
    %c0_54 = arith.constant 0 : index
    %c0_55 = arith.constant 0 : index
    %139 = vector.load %arg7[%c1_53, %c0_54, %c0_55] : memref<2x1x64xf32, #tpu.memory_space<vmem>>, vector<1x1x64xf32>
    %140 = vector.shape_cast %139 : vector<1x1x64xf32> to vector<1x64xf32>
    %141 = arith.mulf %138, %138 : vector<8x64xf32>
    %cst_56 = arith.constant dense<0.000000e+00> : vector<8xf32>
    %142 = vector.multi_reduction <add>, %141, %cst_56 [1] : vector<8x64xf32> to vector<8xf32>
    %143 = vector.shape_cast %142 : vector<8xf32> to vector<8x1xf32>
    %cst_57 = arith.constant 6.400000e+01 : f32
    %144 = vector.broadcast %cst_57 : f32 to vector<8x1xf32>
    %145 = arith.divf %143, %144 : vector<8x1xf32>
    %cst_58 = arith.constant 9.99999997E-7 : f32
    %146 = vector.broadcast %cst_58 : f32 to vector<8x1xf32>
    %147 = arith.addf %145, %146 : vector<8x1xf32>
    %148 = math.rsqrt %147 : vector<8x1xf32>
    %149 = vector.broadcast %148 : vector<8x1xf32> to vector<8x64xf32>
    %150 = arith.mulf %138, %149 : vector<8x64xf32>
    %151 = vector.broadcast %140 : vector<1x64xf32> to vector<8x64xf32>
    %152 = arith.mulf %150, %151 : vector<8x64xf32>
    %153 = arith.truncf %152 : vector<8x64xf32> to vector<8x64xbf16>
    %c1_59 = arith.constant 1 : index
    %c0_60 = arith.constant 0 : index
    %c0_61 = arith.constant 0 : index
    %154 = vector.load %arg8[%c1_59, %c0_60, %c0_61] : memref<2x64x192xbf16, #tpu.memory_space<vmem>>, vector<1x64x192xbf16>
    %155 = vector.shape_cast %154 : vector<1x64x192xbf16> to vector<64x192xbf16>
    %cst_62 = arith.constant dense<0.000000e+00> : vector<8x192xf32>
    %156 = tpu.matmul %153, %155, %cst_62 {dimension_numbers = #tpu.dot_dimension_numbers<[1], [0], [0], [1], [0, 0, 1, 1], [], []>} : vector<8x64xbf16>, vector<64x192xbf16>, vector<8x192xf32> -> vector<8x192xf32>
    %c1_63 = arith.constant 1 : index
    %c0_64 = arith.constant 0 : index
    %c0_65 = arith.constant 0 : index
    %157 = vector.load %arg9[%c1_63, %c0_64, %c0_65] : memref<2x1x192xf32, #tpu.memory_space<vmem>>, vector<1x1x192xf32>
    %158 = vector.shape_cast %157 : vector<1x1x192xf32> to vector<1x192xf32>
    %159 = vector.broadcast %158 : vector<1x192xf32> to vector<8x192xf32>
    %160 = arith.addf %156, %159 : vector<8x192xf32>
    %161 = vector.extract_strided_slice %160 {offsets = [0, 0], sizes = [8, 64], strides = [1, 1]} : vector<8x192xf32> to vector<8x64xf32>
    %162 = vector.extract_strided_slice %160 {offsets = [0, 64], sizes = [8, 64], strides = [1, 1]} : vector<8x192xf32> to vector<8x64xf32>
    %163 = vector.extract_strided_slice %160 {offsets = [0, 128], sizes = [8, 64], strides = [1, 1]} : vector<8x192xf32> to vector<8x64xf32>
    %164 = vector.shape_cast %161 : vector<8x64xf32> to vector<8x4x16xf32>
    %165 = tpu.transpose %164, [1, 0, 2] : vector<8x4x16xf32> -> vector<4x8x16xf32>
    %166 = vector.shape_cast %162 : vector<8x64xf32> to vector<8x4x16xf32>
    %167 = tpu.transpose %166, [1, 0, 2] : vector<8x4x16xf32> -> vector<4x8x16xf32>
    %168 = vector.shape_cast %163 : vector<8x64xf32> to vector<8x4x16xf32>
    %169 = tpu.transpose %168, [1, 0, 2] : vector<8x4x16xf32> -> vector<4x8x16xf32>
    %170 = vector.extract_strided_slice %165 {offsets = [0, 0, 8], sizes = [4, 8, 8], strides = [1, 1, 1]} : vector<4x8x16xf32> to vector<4x8x8xf32>
    %171 = vector.extract_strided_slice %165 {offsets = [0, 0, 0], sizes = [4, 8, 8], strides = [1, 1, 1]} : vector<4x8x16xf32> to vector<4x8x8xf32>
    %172 = tpu.concatenate %170, %171 in 2 : vector<4x8x8xf32>, vector<4x8x8xf32> -> vector<4x8x16xf32>
    %173 = vector.shape_cast %26 : vector<8x16xf32> to vector<1x8x16xf32>
    %174 = vector.broadcast %173 : vector<1x8x16xf32> to vector<4x8x16xf32>
    %175 = arith.mulf %165, %174 : vector<4x8x16xf32>
    %176 = vector.shape_cast %27 : vector<8x16xf32> to vector<1x8x16xf32>
    %177 = vector.broadcast %176 : vector<1x8x16xf32> to vector<4x8x16xf32>
    %178 = arith.mulf %172, %177 : vector<4x8x16xf32>
    %179 = arith.addf %175, %178 : vector<4x8x16xf32>
    %180 = vector.extract_strided_slice %167 {offsets = [0, 0, 8], sizes = [4, 8, 8], strides = [1, 1, 1]} : vector<4x8x16xf32> to vector<4x8x8xf32>
    %181 = vector.extract_strided_slice %167 {offsets = [0, 0, 0], sizes = [4, 8, 8], strides = [1, 1, 1]} : vector<4x8x16xf32> to vector<4x8x8xf32>
    %182 = tpu.concatenate %180, %181 in 2 : vector<4x8x8xf32>, vector<4x8x8xf32> -> vector<4x8x16xf32>
    %183 = vector.shape_cast %28 : vector<8x16xf32> to vector<1x8x16xf32>
    %184 = vector.broadcast %183 : vector<1x8x16xf32> to vector<4x8x16xf32>
    %185 = arith.mulf %167, %184 : vector<4x8x16xf32>
    %186 = vector.shape_cast %29 : vector<8x16xf32> to vector<1x8x16xf32>
    %187 = vector.broadcast %186 : vector<1x8x16xf32> to vector<4x8x16xf32>
    %188 = arith.mulf %182, %187 : vector<4x8x16xf32>
    %189 = arith.addf %185, %188 : vector<4x8x16xf32>
    %190 = arith.truncf %179 : vector<4x8x16xf32> to vector<4x8x16xbf16>
    %191 = arith.truncf %189 : vector<4x8x16xf32> to vector<4x8x16xbf16>
    "tpu.trace_start"() <{level = 10 : i32, message = "hqd,hkd->hqk"}> : () -> ()
    %cst_66 = arith.constant dense<0.000000e+00> : vector<4x8x8xf32>
    %192 = tpu.matmul %190, %191, %cst_66 {dimension_numbers = #tpu.dot_dimension_numbers<[2], [2], [1], [1], [0, 0, 0, 1, 1, 1], [0], [0]>} : vector<4x8x16xbf16>, vector<4x8x16xbf16>, vector<4x8x8xf32> -> vector<4x8x8xf32>
    "tpu.trace_stop"() : () -> ()
    %193 = vector.shape_cast %25 : vector<8x8xf32> to vector<1x8x8xf32>
    %194 = vector.broadcast %193 : vector<1x8x8xf32> to vector<4x8x8xf32>
    %195 = arith.addf %192, %194 : vector<4x8x8xf32>
    %cst_67 = arith.constant dense<0xFF800000> : vector<4x8xf32>
    %196 = vector.multi_reduction <maximumf>, %195, %cst_67 [2] : vector<4x8x8xf32> to vector<4x8xf32>
    %197 = vector.shape_cast %196 : vector<4x8xf32> to vector<4x8x1xf32>
    %198 = vector.broadcast %197 : vector<4x8x1xf32> to vector<4x8x8xf32>
    %199 = arith.subf %195, %198 : vector<4x8x8xf32>
    %200 = math.exp %199 : vector<4x8x8xf32>
    %cst_68 = arith.constant dense<0.000000e+00> : vector<4x8xf32>
    %201 = vector.multi_reduction <add>, %200, %cst_68 [2] : vector<4x8x8xf32> to vector<4x8xf32>
    %202 = vector.shape_cast %201 : vector<4x8xf32> to vector<4x8x1xf32>
    %203 = tpu.reciprocal %202 {approx = true} : vector<4x8x1xf32> -> vector<4x8x1xf32>
    %204 = vector.broadcast %203 : vector<4x8x1xf32> to vector<4x8x8xf32>
    %205 = arith.mulf %200, %204 : vector<4x8x8xf32>
    %206 = arith.truncf %205 : vector<4x8x8xf32> to vector<4x8x8xbf16>
    %207 = arith.truncf %169 : vector<4x8x16xf32> to vector<4x8x16xbf16>
    "tpu.trace_start"() <{level = 10 : i32, message = "hqk,hkd->hqd"}> : () -> ()
    %cst_69 = arith.constant dense<0.000000e+00> : vector<4x8x16xf32>
    %208 = tpu.matmul %206, %207, %cst_69 {dimension_numbers = #tpu.dot_dimension_numbers<[2], [1], [1], [2], [0, 0, 0, 1, 1, 2], [0], [0]>} : vector<4x8x8xbf16>, vector<4x8x16xbf16>, vector<4x8x16xf32> -> vector<4x8x16xf32>
    "tpu.trace_stop"() : () -> ()
    %209 = tpu.transpose %208, [1, 0, 2] : vector<4x8x16xf32> -> vector<8x4x16xf32>
    %210 = vector.shape_cast %209 : vector<8x4x16xf32> to vector<8x64xf32>
    %211 = arith.truncf %210 : vector<8x64xf32> to vector<8x64xbf16>
    %c1_70 = arith.constant 1 : index
    %c0_71 = arith.constant 0 : index
    %c0_72 = arith.constant 0 : index
    %212 = vector.load %arg10[%c1_70, %c0_71, %c0_72] : memref<2x64x64xbf16, #tpu.memory_space<vmem>>, vector<1x64x64xbf16>
    %213 = vector.shape_cast %212 : vector<1x64x64xbf16> to vector<64x64xbf16>
    %cst_73 = arith.constant dense<0.000000e+00> : vector<8x64xf32>
    %214 = tpu.matmul %211, %213, %cst_73 {dimension_numbers = #tpu.dot_dimension_numbers<[1], [0], [0], [1], [0, 0, 1, 1], [], []>} : vector<8x64xbf16>, vector<64x64xbf16>, vector<8x64xf32> -> vector<8x64xf32>
    %215 = arith.addf %138, %214 : vector<8x64xf32>
    %c1_74 = arith.constant 1 : index
    %c0_75 = arith.constant 0 : index
    %c0_76 = arith.constant 0 : index
    %216 = vector.load %arg11[%c1_74, %c0_75, %c0_76] : memref<2x1x64xf32, #tpu.memory_space<vmem>>, vector<1x1x64xf32>
    %217 = vector.shape_cast %216 : vector<1x1x64xf32> to vector<1x64xf32>
    %218 = arith.mulf %215, %215 : vector<8x64xf32>
    %cst_77 = arith.constant dense<0.000000e+00> : vector<8xf32>
    %219 = vector.multi_reduction <add>, %218, %cst_77 [1] : vector<8x64xf32> to vector<8xf32>
    %220 = vector.shape_cast %219 : vector<8xf32> to vector<8x1xf32>
    %cst_78 = arith.constant 6.400000e+01 : f32
    %221 = vector.broadcast %cst_78 : f32 to vector<8x1xf32>
    %222 = arith.divf %220, %221 : vector<8x1xf32>
    %cst_79 = arith.constant 9.99999997E-7 : f32
    %223 = vector.broadcast %cst_79 : f32 to vector<8x1xf32>
    %224 = arith.addf %222, %223 : vector<8x1xf32>
    %225 = math.rsqrt %224 : vector<8x1xf32>
    %226 = vector.broadcast %225 : vector<8x1xf32> to vector<8x64xf32>
    %227 = arith.mulf %215, %226 : vector<8x64xf32>
    %228 = vector.broadcast %217 : vector<1x64xf32> to vector<8x64xf32>
    %229 = arith.mulf %227, %228 : vector<8x64xf32>
    %230 = arith.truncf %229 : vector<8x64xf32> to vector<8x64xbf16>
    %c1_80 = arith.constant 1 : index
    %c0_81 = arith.constant 0 : index
    %c0_82 = arith.constant 0 : index
    %231 = vector.load %arg12[%c1_80, %c0_81, %c0_82] : memref<2x64x256xbf16, #tpu.memory_space<vmem>>, vector<1x64x256xbf16>
    %232 = vector.shape_cast %231 : vector<1x64x256xbf16> to vector<64x256xbf16>
    %cst_83 = arith.constant dense<0.000000e+00> : vector<8x256xf32>
    %233 = tpu.matmul %230, %232, %cst_83 {dimension_numbers = #tpu.dot_dimension_numbers<[1], [0], [0], [1], [0, 0, 1, 1], [], []>} : vector<8x64xbf16>, vector<64x256xbf16>, vector<8x256xf32> -> vector<8x256xf32>
    %234 = vector.extract_strided_slice %233 {offsets = [0, 0], sizes = [8, 128], strides = [1, 1]} : vector<8x256xf32> to vector<8x128xf32>
    %235 = vector.extract_strided_slice %233 {offsets = [0, 128], sizes = [8, 128], strides = [1, 1]} : vector<8x256xf32> to vector<8x128xf32>
    %236 = arith.negf %234 : vector<8x128xf32>
    %237 = math.exp %236 : vector<8x128xf32>
    %cst_84 = arith.constant 1.000000e+00 : f32
    %238 = vector.broadcast %cst_84 : f32 to vector<8x128xf32>
    %239 = arith.addf %238, %237 : vector<8x128xf32>
    %240 = arith.divf %238, %239 : vector<8x128xf32>
    %241 = arith.mulf %234, %240 : vector<8x128xf32>
    %242 = arith.mulf %241, %235 : vector<8x128xf32>
    %243 = arith.truncf %242 : vector<8x128xf32> to vector<8x128xbf16>
    %c1_85 = arith.constant 1 : index
    %c0_86 = arith.constant 0 : index
    %c0_87 = arith.constant 0 : index
    %244 = vector.load %arg13[%c1_85, %c0_86, %c0_87] : memref<2x128x64xbf16, #tpu.memory_space<vmem>>, vector<1x128x64xbf16>
    %245 = vector.shape_cast %244 : vector<1x128x64xbf16> to vector<128x64xbf16>
    %cst_88 = arith.constant dense<0.000000e+00> : vector<8x64xf32>
    %246 = tpu.matmul %243, %245, %cst_88 {dimension_numbers = #tpu.dot_dimension_numbers<[1], [0], [0], [1], [0, 0, 1, 1], [], []>} : vector<8x128xbf16>, vector<128x64xbf16>, vector<8x64xf32> -> vector<8x64xf32>
    %247 = arith.addf %215, %246 : vector<8x64xf32>
    %c0_89 = arith.constant 0 : index
    %c0_90 = arith.constant 0 : index
    %248 = vector.load %arg14[%c0_89, %c0_90] : memref<1x64xf32, #tpu.memory_space<vmem>>, vector<1x64xf32>
    %249 = arith.mulf %247, %247 : vector<8x64xf32>
    %cst_91 = arith.constant dense<0.000000e+00> : vector<8xf32>
    %250 = vector.multi_reduction <add>, %249, %cst_91 [1] : vector<8x64xf32> to vector<8xf32>
    %251 = vector.shape_cast %250 : vector<8xf32> to vector<8x1xf32>
    %cst_92 = arith.constant 6.400000e+01 : f32
    %252 = vector.broadcast %cst_92 : f32 to vector<8x1xf32>
    %253 = arith.divf %251, %252 : vector<8x1xf32>
    %cst_93 = arith.constant 9.99999997E-7 : f32
    %254 = vector.broadcast %cst_93 : f32 to vector<8x1xf32>
    %255 = arith.addf %253, %254 : vector<8x1xf32>
    %256 = math.rsqrt %255 : vector<8x1xf32>
    %257 = vector.broadcast %256 : vector<8x1xf32> to vector<8x64xf32>
    %258 = arith.mulf %247, %257 : vector<8x64xf32>
    %259 = vector.broadcast %248 : vector<1x64xf32> to vector<8x64xf32>
    %260 = arith.mulf %258, %259 : vector<8x64xf32>
    %261 = arith.truncf %260 : vector<8x64xf32> to vector<8x64xbf16>
    %c0_94 = arith.constant 0 : index
    %c0_95 = arith.constant 0 : index
    %262 = vector.load %arg15[%c0_94, %c0_95] : memref<64x128xbf16, #tpu.memory_space<vmem>>, vector<64x128xbf16>
    %cst_96 = arith.constant dense<0.000000e+00> : vector<8x128xf32>
    %263 = tpu.matmul %261, %262, %cst_96 {dimension_numbers = #tpu.dot_dimension_numbers<[1], [0], [0], [1], [0, 0, 1, 1], [], []>} : vector<8x64xbf16>, vector<64x128xbf16>, vector<8x128xf32> -> vector<8x128xf32>
    %c0_97 = arith.constant 0 : index
    %c0_98 = arith.constant 0 : index
    %264 = vector.load %arg16[%c0_97, %c0_98] : memref<8x128xf32, #tpu.memory_space<vmem>>, vector<8x128xf32>
    tpu.vector_store %arg16[%c0_97, %c0_98], %263 {strides = array<i32>} : memref<8x128xf32, #tpu.memory_space<vmem>>, vector<8x128xf32>,
    return
  }
}

</mosaic_0001>

<bundles_post_ra>
// kernel: qwen_forward.1
= control target key start
LH: loop header
LB: loop body
LE: loop exit
PB: predicated region body
PF: predicated region fallthrough
CT: control target
= control target key end

     0   :  { %s4036_s0 = inlined_call_operand.vmem [shape: s32[8], index: 0, kind: input, shape index: {}]   ;;  %s4037_s1 = inlined_call_operand.vmem [shape: f32[8,16], index: 1, kind: input, shape index: {}]   ;;  %s4038_s2 = inlined_call_operand.vmem [shape: f32[8,16], index: 2, kind: input, shape index: {}]   ;;  %s4039_s3 = inlined_call_operand.vmem [shape: f32[8,16], index: 3, kind: input, shape index: {}]   ;;  %s4040_s4 = inlined_call_operand.vmem [shape: f32[8,16], index: 4, kind: input, shape index: {}]   ;;  %s4041_s5 = inlined_call_operand.vmem [shape: f32[8,8], index: 5, kind: input, shape index: {}]   ;;  %s4042_s6 = inlined_call_operand.vmem [shape: f32[128,64], index: 6, kind: input, shape index: {}]   ;;  %s4043_s7 = inlined_call_operand.vmem [shape: f32[2,1,64], index: 7, kind: input, shape index: {}]   ;;  %s4044_s8 = inlined_call_operand.vmem [shape: bf16[2,64,192], index: 8, kind: input, shape index: {}]   ;;  %s4045_s9 = inlined_call_operand.vmem [shape: f32[2,1,192], index: 9, kind: input, shape index: {}]   ;;  %s4046_s10 = inlined_call_operand.vmem [shape: bf16[2,64,64], index: 10, kind: input, shape index: {}]   ;;  %s4047_s11 = inlined_call_operand.vmem [shape: f32[2,1,64], index: 11, kind: input, shape index: {}]   ;;  %s4048_s12 = inlined_call_operand.vmem [shape: bf16[2,64,256], index: 12, kind: input, shape index: {}]   ;;  %s4049_s13 = inlined_call_operand.vmem [shape: bf16[2,128,64], index: 13, kind: input, shape index: {}]   ;;  %s4050_s14 = inlined_call_operand.vmem [shape: f32[1,64], index: 14, kind: input, shape index: {}]   ;;  %s4051_s15 = inlined_call_operand.vmem [shape: bf16[64,128], index: 15, kind: input, shape index: {}]   ;;  %s4052_s16 = inlined_call_operand.vmem [shape: f32[8,128], index: 16, kind: output, shape index: {}]  }
   0x1   :  { %4056 = sst [smem:[#allocation5_spill]] %s4036_s0 }
   0x2   :  { %4057 = sst [smem:[#allocation6_spill]] %s4047_s11 }
   0x3   :  { %4058 = sst [smem:[#allocation7_spill]] %s4049_s13 }
   0x4   :  { %4059 = sst [smem:[#allocation8_spill]] %s4050_s14 }
   0x5   :  { %4060 = sst [smem:[#allocation9_spill]] %s4051_s15 }
   0x6   :  { %4061 = sst [smem:[#allocation10_spill]] %s4052_s16 }
   0x7   :  { %21 = vsyncpa [#allocation3], 0  ;;  %s4062_s23 = sld [smem:[#allocation5_spill]]  ;;  %s2990_s25 = smov [#allocation2]  }
   0xd   :  { %s27_s24 = sshll.u32 %s4062_s23, 4  ;;  %s28_s24 = int_to_ptr.vmem [resolvable:$true] %s27_s24 }
   0xe   :  { %30 = dma.vmem_to_smem %s28_s24, 16, %s2990_s25, [#allocation3]  }
   0xf   :  { %2988 = dma.done.wait [#allocation3], 16  }
  0x10   :  { %2989 = vsyncadd [#allocation3], 4294967280 }
  0x11   :  { %65 = sfence }
  0x12   :  { %s67_s26 = sld [smem:[#allocation2]]  ;;  %vm112_vm0 = vcmask 1040384   ;;  %vm114_vm1 = vcmask 1041408   ;;  %vm116_vm2 = vcmask 1042432   ;;  %vm118_vm3 = vcmask 1043456   ;;  %s2992_s13 = smov 64  }
  0x13   :  { %s2522_s27 = sld [smem:[#allocation2 + $0x1]]  ;;  %vm120_vm4 = vcmask 1044480   ;;  %vm122_vm5 = vcmask 1045504   ;;  %vm124_vm6 = vcmask 1046528   ;;  %vm133_vm7 = vcmask 523264   ;;  %s3000_s17 = smov 48  }
  0x14   :  { %s2523_s28 = sld [smem:[#allocation2 + $0x2]]  ;;  %v2991_v24 = vmov 64.0   ;;  %v2555_v26 = vld [vmem:[%s4044_s8 + $0x30] sm:$0xf]  ;;  %v2848_v27 = vld [vmem:[%s4044_s8 + $0x34] sm:$0xf0] }
  0x15   :  { %s2524_s29 = sld [smem:[#allocation2 + $0x3]]  ;;  %2919 = vrcp.f32 %v2991_v24  ;;  %v2847_v28 = vld [vmem:[%s4044_s8 + $0x34] sm:$0xf]  ;;  %v2556_v29 = vor.u32 %v2848_v27, %v2555_v26  ;;  %v2557_v30 = vld [vmem:[%s4044_s8 + $0x38] sm:$0xf0]  ;;  %vm256_vm12 = vcmask 1047556  }
  0x16   :  { %s2525_s30 = sld [smem:[#allocation2 + $0x4]]  ;;  %v2560_v31 = vor.u32 %v2847_v28, %v2557_v30  ;;  %v2547_v33 = vld [vmem:[%s4044_s8 + $0x20] sm:$0xf]  ;;  %v2846_v34 = vld [vmem:[%s4044_s8 + $0x24] sm:$0xf0]  ;;  %vm636_vm13 = vcmask 64512  }
  0x17   :  { %s2526_s0 = sld [smem:[#allocation2 + $0x5]]  ;;  %223 = vmatpush.bf16.msra.mxu0 %v2556_v29  ;;  %v2845_v35 = vld [vmem:[%s4044_s8 + $0x24] sm:$0xf]  ;;  %v2548_v36 = vor.u32 %v2846_v34, %v2547_v33  ;;  %v2549_v37 = vld [vmem:[%s4044_s8 + $0x28] sm:$0xf0]  ;;  %vm705_vm14 = vcmask 130048  }
  0x18   :  { %s68_s19 = scalar_lea.vmem %s4042_s6, %s67_s26  ;;  %s2527_s20 = sld [smem:[#allocation2 + $0x6]]  ;;  %236 = vmatpush.bf16.msra.mxu1 %v2560_v31  ;;  %v2552_v38 = vor.u32 %v2845_v35, %v2549_v37  ;;  %v2539_v40 = vld [vmem:[%s4044_s8 + $0x10] sm:$0xf]  ;;  %v2844_v41 = vld [vmem:[%s4044_s8 + $0x14] sm:$0xf0]  ;;  %vm1033_vm15 = vcmask 261120  }
  0x19   :  { %s71_s22 = scalar_lea.vmem %s4042_s6, %s2522_s27  ;;  %s2528_s23 = sld [smem:[#allocation2 + $0x7]]  ;;  %v69_v0 = vld [vmem:[%s68_s19] sm:$0x1]  ;;  %v2843_v42 = vld [vmem:[%s4044_s8 + $0x14] sm:$0xf]  ;;  %v2540_v43 = vor.u32 %v2844_v41, %v2539_v40 }
  0x1a   :  { %v72_v1 = vld [vmem:[%s71_s22] sm:$0x1]  ;;  %s74_s14 = scalar_lea.vmem %s4042_s6, %s2523_s28  ;;  %v2541_v44 = vld [vmem:[%s4044_s8 + $0x18] sm:$0xf0]  ;;  %v2842_v46 = vld [vmem:[%s4044_s8 + $0x4] sm:$0xf0] }
  0x1b   :  { %v75_v2 = vld [vmem:[%s74_s14] sm:$0x1]  ;;  %s77_s11 = scalar_lea.vmem %s4042_s6, %s2524_s29  ;;  %v92_v3 = vrot.slane %v72_v1, 7  ;;  %v2920_v25 = vpop.eup %2919  ;;  %224 = vmatpush.bf16.msra.mxu0 %v2548_v36  ;;  %v2544_v47 = vor.u32 %v2843_v42, %v2541_v44  ;;  %v2841_v48 = vld [vmem:[%s4044_s8 + $0x4] sm:$0xf]  ;;  %s2993_s14 = smov 80  }
  0x1c   :  { %v78_v4 = vld [vmem:[%s77_s11] sm:$0x1]  ;;  %s80_s16 = scalar_lea.vmem %s4042_s6, %s2525_s30  ;;  %v95_v5 = vrot.slane %v75_v2, 6  ;;  %v138_v32 = vmul.f32 64.0, %v2920_v25  ;;  %237 = vmatpush.bf16.msra.mxu1 %v2552_v38  ;;  %v2533_v49 = vld [vmem:[%s4044_s8 + $0x8] sm:$0xf0]  ;;  %vm142_vm8 = vweird.f32 %v2920_v25 }
  0x1d   :  { %v81_v6 = vld [vmem:[%s80_s16] sm:$0x1]  ;;  %s83_s28 = scalar_lea.vmem %s4042_s6, %s2526_s0  ;;  %v98_v7 = vrot.slane %v78_v4, 5  ;;  %v113_v8 = vsel %vm112_vm0, %v69_v0, %v92_v3  ;;  %v2536_v52 = vor.u32 %v2841_v48, %v2533_v49  ;;  %s2995_s11 = smov 112   ;;  %vm1035_vm0 = vcmask 392192  }
  0x1e   :  { %v84_v9 = vld [vmem:[%s83_s28] sm:$0x1]  ;;  %s86_s15 = scalar_lea.vmem %s4042_s6, %s2527_s20  ;;  %v101_v10 = vrot.slane %v81_v6, 4  ;;  %v115_v11 = vsel %vm114_vm1, %v113_v8, %v95_v5  ;;  %v139_v39 = vsub.f32 1.0, %v138_v32  ;;  %s2998_s29 = smov 120  }
  0x1f   :  { %v87_v12 = vld [vmem:[%s86_s15] sm:$0x1]  ;;  %s89_s30 = scalar_lea.vmem %s4042_s6, %s2528_s23  ;;  %v104_v13 = vrot.slane %v84_v9, 3  ;;  %v117_v14 = vsel %vm116_vm2, %v115_v11, %v98_v7  ;;  %225 = vmatpush.bf16.msra.mxu0 %v2540_v43  ;;  %s2994_s15 = smov 96  }
  0x20   :  { %v90_v15 = vld [vmem:[%s89_s30] sm:$0x1]  ;;  %v107_v16 = vrot.slane %v87_v12, 2  ;;  %v119_v17 = vsel %vm118_vm3, %v117_v14, %v101_v10  ;;  %v140_v50 = vmul.f32 %v2920_v25, %v139_v39  ;;  %238 = vmatpush.bf16.msra.mxu1 %v2544_v47  ;;  %s2999_s30 = smov 8   ;;  %s3001_s16 = smov 32  }
  0x21   :  { %v110_v18 = vrot.slane %v90_v15, 1  ;;  %v121_v19 = vsel %vm120_vm4, %v119_v17, %v104_v13  ;;  %v2531_v45 = vld [vmem:[%s4044_s8] sm:$0xf]  ;;  %v2996_v13 = vmov 1983009808   ;;  %s3002_s27 = smov 16  }
  0x22   :  { %v123_v20 = vsel %vm122_vm5, %v121_v19, %v107_v16  ;;  %v2532_v51 = vor.u32 %v2842_v46, %v2531_v45  ;;  %v141_v53 = vadd.f32 %v2920_v25, %v140_v50  ;;  %v2914_v0 = vld [vmem:[%s4043_s7] ss:$0 sm:$0xff]  ;;  %v261_v14 = vunpack.c.l.s4 %v2996_v13  ;;  %s4063_s21 = sld [smem:[#allocation6_spill]] }
  0x23   :  { %v3116_v21 = vsel %vm124_vm6, %v123_v20, %v110_v18  ;;  %v3181_v5 = vld [vmem:[%s4045_s9] sm:$0x3]  ;;  %s4064_s24 = sld [smem:[#allocation7_spill]] }
  0x24   :  { %v132_v22 = vmul.f32 %v3116_v21, %v3116_v21  ;;  %226 = vmatpush.bf16.msra.mxu0 %v2532_v51  ;;  %239 = vmatpush.bf16.msra.mxu1 %v2536_v52  ;;  %v3169_v54 = vsel %vm142_vm8, %v2920_v25, %v141_v53  ;;  %v172_v6 = vperm.slane %v3181_v5, 0  ;;  %v3192_v18 = vunpack.c.0.s8 %v261_v14  ;;  %s4066_s18 = sld [smem:[#allocation8_spill]] }
  0x25   :  { %s4067_s0 = sld [smem:[#allocation10_spill]] }
  0x26   :  { %v134_v23 = vsel %vm133_vm7, %v132_v22, 0.0  ;;  %v2997_v22 = vmov 1934713408  }
  0x27   :  { %135 = vadd.xlane.f32.xlu0 %v134_v23  ;;  %v285_v23 = vunpack.c.l.s4 %v2997_v22 }
  0x29   :  { %v3198_v28 = vunpack.c.0.s8 %v285_v23 }
  0x9a   :  { %v136_v55 = vpop.xlane.xlu0 %135 }
  0x9b   :  { %v144_v56 = vmul.f32 %v3169_v54, %v136_v55 }
  0x9d   :  { %v145_v57 = vadd.f32 1e-06, %v144_v56 }
  0x9f   :  { %2921 = vrsqrt.f32 %v145_v57  ;;  %vm152_vm10 = vweird.f32 %v145_v57 }
  0xa5   :  { %v2922_v58 = vpop.eup %2921 }
  0xa6   :  { %v147_v59 = vmul.f32 %v2922_v58, %v145_v57  ;;  %vm153_vm9 = vweird.f32 %v2922_v58 }
  0xa7   :  { %vm154_vm11 = vmor %vm152_vm10, %vm153_vm9 }
  0xa8   :  { %v148_v60 = vmul.f32 %v2922_v58, %v147_v59 }
  0xaa   :  { %v149_v61 = vmul.f32 0.5, %v148_v60 }
  0xac   :  { %v150_v62 = vsub.f32 1.5, %v149_v61 }
  0xae   :  { %v151_v63 = vmul.f32 %v2922_v58, %v150_v62 }
  0xb0   :  { %v155_v1 = vsel %vm154_vm11, %v2922_v58, %v151_v63 }
  0xb1   :  { %v156_v2 = vmul.f32 %v155_v1, %v3116_v21 }
  0xb3   :  { %v160_v3 = vmul.f32 %v2914_v0, %v156_v2 }
  0xb5   :  { %v161_v4 = vpack.c.bf16 %v160_v3, %v160_v3 }
  0xb7   :  { %2561 = vmatmul.msk.bf16.vlgmr.msra.gmra.mxu0 %vm133_vm7, %v161_v4  ;;  %2562 = vmatmul.msk.bf16.vlgmr.msra.gmra.mxu1 %vm133_vm7, %v161_v4 }
 0x134   :  { %v228_v7 = vpop.f32.mrf.mxu0  ;;  %v3184_v8 = vpop.f32.mrf.mxu1 }
 0x135   :  { %v229_v9 = vadd.f32 %v228_v7, %v172_v6 }
 0x137   :  { %366 = vrot.lane.b32.xlu2 %v229_v9, %s2992_s13  ;;  %252 = vrot.lane.b32.xlu1 %v229_v9, %s2993_s14  ;;  %v258_v17 = vrot.slane %v229_v9, 4 }
 0x138   :  { %249 = vrot.lane.b32.xlu0 %v229_v9, %s2994_s15 }
 0x13c   :  { %v230_v10 = vpop.f32.mrf.mxu0  ;;  %v243_v11 = vpop.f32.mrf.mxu1 }
 0x13f   :  { %246 = vrot.lane.b32.xlu1 %v229_v9, %s2995_s11 }
 0x1a9   :  { %v253_v12 = vpop.permute.xlu1 %252 }
 0x1aa   :  { %v250_v15 = vpop.permute.xlu0 %249  ;;  %372 = vrot.lane.b32.xlu1 %v253_v12, %s2992_s13  ;;  %v268_v25 = vrot.slane %v253_v12, 4 }
 0x1ab   :  { %v255_v16 = vrot.slane %v250_v15, 4  ;;  %370 = vrot.lane.b32.xlu2 %v250_v15, %s2992_s13  ;;  %v259_v20 = vsel %vm256_vm12, %v250_v15, %v258_v17 }
 0x1ac   :  { %v267_v26 = vperm.slane %v259_v20, %v3192_v18 }
 0x1ad   :  { %v257_v19 = vsel %vm256_vm12, %v255_v16, %v229_v9 }
 0x1ae   :  { %v263_v24 = vperm.slane %v257_v19, %v3192_v18  ;;  %v294_v34 = vrot.slane %v267_v26, 4 }
 0x1b0   :  { %v282_v31 = vrot.slane %v263_v24, 4 }
 0x1b1   :  { %v247_v27 = vpop.permute.xlu1 %246 }
 0x1b2   :  { %v269_v29 = vsel %vm256_vm12, %v268_v25, %v247_v27  ;;  %v270_v30 = vrot.slane %v247_v27, 4  ;;  %v367_v25 = vpop.permute.xlu2 %366 }
 0x1b3   :  { %v275_v32 = vperm.slane %v269_v29, %v3192_v18  ;;  %368 = vrot.lane.b32.xlu2 %v247_v27, %s2992_s13  ;;  %v380_v27 = vrot.slane %v367_v25, 4 }
 0x1b4   :  { %v271_v33 = vsel %vm256_vm12, %v253_v12, %v270_v30 }
 0x1b5   :  { %v279_v35 = vperm.slane %v271_v33, %v3192_v18  ;;  %v280_v36 = vrot.slane %v275_v32, 4  ;;  %v283_v37 = vsel %vm256_vm12, %v275_v32, %v282_v31 }
 0x1b6   :  { %v291_v38 = vperm.slane %v283_v37, %v3198_v28 }
 0x1b7   :  { %v281_v39 = vsel %vm256_vm12, %v280_v36, %v263_v24  ;;  %v292_v40 = vrot.slane %v279_v35, 4  ;;  %v295_v41 = vsel %vm256_vm12, %v279_v35, %v294_v34 }
 0x1b8   :  { %v287_v42 = vperm.slane %v281_v39, %v3198_v28  ;;  %v303_v43 = vperm.slane %v295_v41, %v3198_v28  ;;  %v306_v44 = vrot.slane %v291_v38, 4 }
 0x1b9   :  { %v293_v45 = vsel %vm256_vm12, %v292_v40, %v267_v26 }
 0x1ba   :  { %v299_v46 = vperm.slane %v293_v45, %v3198_v28  ;;  %v304_v47 = vrot.slane %v287_v42, 4  ;;  %v307_v48 = vsel %vm256_vm12, 0.0, %v306_v44  ;;  %v310_v49 = vrot.slane %v303_v43, 4 }
 0x1bb   :  { %v317_v50 = vrot.slane %v307_v48, 4  ;;  %v312_v51 = vsel %vm256_vm12, %v306_v44, %v287_v42 }
 0x1bc   :  { %v305_v52 = vsel %vm256_vm12, 0.0, %v304_v47  ;;  %v308_v53 = vrot.slane %v299_v46, 4  ;;  %v311_v55 = vsel %vm256_vm12, 0.0, %v310_v49  ;;  %v316_v56 = vperm.slane %v312_v51, %v3192_v18 }
 0x1bd   :  { %v328_v57 = vrot.slane %v311_v55, 4  ;;  %v318_v58 = vsel %vm256_vm12, %v317_v50, %v305_v52  ;;  %v323_v59 = vsel %vm256_vm12, %v310_v49, %v299_v46 }
 0x1be   :  { %v309_v60 = vsel %vm256_vm12, 0.0, %v308_v53  ;;  %v322_v61 = vperm.slane %v318_v58, %v3192_v18  ;;  %v327_v62 = vperm.slane %v323_v59, %v3192_v18  ;;  %v336_v63 = vrot.slane %v316_v56, 4 }
 0x1bf   :  { %v329_v0 = vsel %vm256_vm12, %v328_v57, %v309_v60 }
 0x1c0   :  { %v333_v1 = vperm.slane %v329_v0, %v3192_v18  ;;  %v334_v2 = vrot.slane %v322_v61, 4  ;;  %v337_v3 = vsel %vm256_vm12, %v322_v61, %v336_v63  ;;  %v348_v4 = vrot.slane %v327_v62, 4 }
 0x1c1   :  { %v345_v6 = vperm.slane %v337_v3, %v3198_v28 }
 0x1c2   :  { %v335_v7 = vsel %vm256_vm12, %v334_v2, %v316_v56  ;;  %v346_v9 = vrot.slane %v333_v1, 4  ;;  %v349_v10 = vsel %vm256_vm12, %v333_v1, %v348_v4 }
 0x1c3   :  { %v341_v11 = vperm.slane %v335_v7, %v3198_v28  ;;  %v357_v12 = vperm.slane %v349_v10, %v3198_v28  ;;  %v364_v13 = vrot.slane %v345_v6, 4 }
 0x1c4   :  { %v347_v14 = vsel %vm256_vm12, %v346_v9, %v327_v62 }
 0x1c5   :  { %v353_v15 = vperm.slane %v347_v14, %v3198_v28  ;;  %v360_v16 = vrot.slane %v341_v11, 4  ;;  %v362_v17 = vrot.slane %v357_v12, 4  ;;  %v3234_v19 = vsel %vm256_vm12, %v357_v12, %v364_v13 }
 0x1c7   :  { %v3237_v20 = vsel %vm256_vm12, %v353_v15, %v360_v16  ;;  %v3240_v22 = vsel %vm256_vm12, %v362_v17, %v345_v6  ;;  %v358_v23 = vrot.slane %v353_v15, 4 }
 0x1c8   :  { %614 = vrot.lane.b32.xlu0 %v3237_v20, %s2998_s29 }
 0x1c9   :  { %v3245_v24 = vsel %vm256_vm12, %v358_v23, %v341_v11 }
 0x205   :  { %v371_v26 = vpop.permute.xlu2 %370 }
 0x206   :  { %v378_v29 = vrot.slane %v371_v26, 4  ;;  %v381_v30 = vsel %vm256_vm12, %v371_v26, %v380_v27 }
 0x207   :  { %v389_v33 = vperm.slane %v381_v30, %v3192_v18 }
 0x208   :  { %v379_v32 = vsel %vm256_vm12, %v378_v29, %v367_v25 }
 0x209   :  { %v385_v35 = vperm.slane %v379_v32, %v3192_v18  ;;  %v416_v39 = vrot.slane %v389_v33, 4 }
 0x20b   :  { %v404_v42 = vrot.slane %v385_v35, 4 }
 0x20d   :  { %v369_v31 = vpop.permute.xlu2 %368 }
 0x20e   :  { %v392_v34 = vrot.slane %v369_v31, 4 }
 0x21c   :  { %v373_v36 = vpop.permute.xlu1 %372 }
 0x21d   :  { %v390_v37 = vrot.slane %v373_v36, 4  ;;  %v393_v38 = vsel %vm256_vm12, %v373_v36, %v392_v34 }
 0x21e   :  { %v401_v40 = vperm.slane %v393_v38, %v3192_v18 }
 0x21f   :  { %v391_v41 = vsel %vm256_vm12, %v390_v37, %v369_v31 }
 0x220   :  { %v397_v43 = vperm.slane %v391_v41, %v3192_v18  ;;  %v414_v44 = vrot.slane %v401_v40, 4  ;;  %v417_v45 = vsel %vm256_vm12, %v401_v40, %v416_v39  ;;  %v129_v40 = vld [vmem:[%s4039_s3] sm:$0xff] }
 0x221   :  { %v425_v46 = vperm.slane %v417_v45, %v3198_v28  ;;  %v130_v41 = vld [vmem:[%s4040_s4] sm:$0xff] }
 0x222   :  { %v402_v47 = vrot.slane %v397_v43, 4  ;;  %v405_v48 = vsel %vm256_vm12, %v397_v43, %v404_v42  ;;  %v415_v49 = vsel %vm256_vm12, %v414_v44, %v389_v33 }
 0x223   :  { %v413_v50 = vperm.slane %v405_v48, %v3198_v28  ;;  %v421_v51 = vperm.slane %v415_v49, %v3198_v28  ;;  %v432_v52 = vrot.slane %v425_v46, 4 }
 0x224   :  { %v403_v53 = vsel %vm256_vm12, %v402_v47, %v385_v35 }
 0x225   :  { %v409_v55 = vperm.slane %v403_v53, %v3198_v28  ;;  %v428_v56 = vrot.slane %v413_v50, 4  ;;  %v430_v57 = vrot.slane %v421_v51, 4  ;;  %v433_v58 = vsel %vm256_vm12, 0.0, %v432_v52 }
 0x226   :  { %v445_v59 = vsel %vm256_vm12, %v432_v52, %v421_v51  ;;  %v450_v60 = vrot.slane %v433_v58, 4  ;;  %v128_v58 = vld [vmem:[%s4038_s2] sm:$0xff] }
 0x227   :  { %v426_v61 = vrot.slane %v409_v55, 4  ;;  %v429_v62 = vsel %vm256_vm12, 0.0, %v428_v56  ;;  %v431_v63 = vsel %vm256_vm12, 0.0, %v430_v57  ;;  %v449_v0 = vperm.slane %v445_v59, %v3192_v18 }
 0x228   :  { %v439_v1 = vrot.slane %v429_v62, 4  ;;  %v434_v2 = vsel %vm256_vm12, %v428_v56, %v409_v55  ;;  %v451_v3 = vsel %vm256_vm12, %v450_v60, %v431_v63  ;;  %v127_v62 = vld [vmem:[%s4037_s1] sm:$0xff] }
 0x229   :  { %v427_v4 = vsel %vm256_vm12, 0.0, %v426_v61  ;;  %v438_v6 = vperm.slane %v434_v2, %v3192_v18  ;;  %v455_v7 = vperm.slane %v451_v3, %v3192_v18  ;;  %v470_v9 = vrot.slane %v449_v0, 4 }
 0x22a   :  { %v440_v10 = vsel %vm256_vm12, %v439_v1, %v427_v4 }
 0x22b   :  { %v444_v11 = vperm.slane %v440_v10, %v3192_v18  ;;  %v458_v12 = vrot.slane %v438_v6, 4  ;;  %v471_v13 = vsel %vm256_vm12, %v455_v7, %v470_v9  ;;  %v468_v14 = vrot.slane %v455_v7, 4 }
 0x22c   :  { %v479_v15 = vperm.slane %v471_v13, %v3198_v28 }
 0x22d   :  { %v459_v16 = vsel %vm256_vm12, %v444_v11, %v458_v12  ;;  %v456_v17 = vrot.slane %v444_v11, 4  ;;  %v469_v27 = vsel %vm256_vm12, %v468_v14, %v449_v0  ;;  %v642_v0 = vmul.f32 %v3237_v20, %v127_v62 }
 0x22e   :  { %v467_v23 = vperm.slane %v459_v16, %v3198_v28  ;;  %v484_v25 = vrot.slane %v479_v15, 4  ;;  %v475_v31 = vperm.slane %v469_v27, %v3198_v28  ;;  %v644_v16 = vmul.f32 %v3234_v19, %v127_v62 }
 0x22f   :  { %v457_v26 = vsel %vm256_vm12, %v456_v17, %v438_v6 }
 0x230   :  { %v485_v29 = vsel %vm256_vm12, %v484_v25, %v467_v23  ;;  %v463_v30 = vperm.slane %v457_v26, %v3198_v28  ;;  %v486_v34 = vrot.slane %v467_v23, 4  ;;  %v480_v36 = vrot.slane %v475_v31, 4 }
 0x231   :  { %673 = vrot.lane.b32.xlu0 %v485_v29, %s2999_s30  ;;  %v687_v45 = vmul.f32 %v485_v29, %v129_v40  ;;  %v643_v25 = vmul.f32 %v3240_v22, %v127_v62 }
 0x232   :  { %v482_v32 = vrot.slane %v463_v30, 4  ;;  %v487_v35 = vsel %vm256_vm12, %v479_v15, %v486_v34  ;;  %v3305_v37 = vsel %vm256_vm12, %v480_v36, %v463_v30 }
 0x233   :  { %v688_v9 = vmul.f32 %v487_v35, %v129_v40  ;;  %v685_v34 = vmul.f32 %v3305_v37, %v129_v40 }
 0x234   :  { %v483_v33 = vsel %vm256_vm12, %v475_v31, %v482_v32 }
 0x235   :  { %671 = vrot.lane.b32.xlu2 %v483_v33, %s2999_s30  ;;  %659 = vrot.lane.b32.xlu1 %v483_v33, %s2998_s29  ;;  %v686_v50 = vmul.f32 %v483_v33, %v129_v40 }
 0x239   :  { %616 = vrot.lane.b32.xlu0 %v3240_v22, %s2998_s29 }
 0x23a   :  { %v615_v39 = vpop.permute.xlu0 %614 }
 0x23d   :  { %661 = vrot.lane.b32.xlu2 %v485_v29, %s2998_s29  ;;  %626 = vrot.lane.b32.xlu1 %v3237_v20, %s2999_s30 }
 0x241   :  { %630 = vrot.lane.b32.xlu0 %v3234_v19, %s2999_s30 }
 0x245   :  { %675 = vrot.lane.b32.xlu2 %v487_v35, %s2999_s30  ;;  %663 = vrot.lane.b32.xlu1 %v487_v35, %s2998_s29 }
 0x249   :  { %612 = vrot.lane.b32.xlu0 %v3245_v24, %s2998_s29 }
 0x24d   :  { %618 = vrot.lane.b32.xlu2 %v3234_v19, %s2998_s29  ;;  %628 = vrot.lane.b32.xlu1 %v3240_v22, %s2999_s30 }
 0x255   :  { %669 = vrot.lane.b32.xlu2 %v3305_v37, %s2999_s30  ;;  %657 = vrot.lane.b32.xlu1 %v3305_v37, %s2998_s29  ;;  %v126_v37 = vld [vmem:[%s4041_s5] sm:$0xff] }
 0x25d   :  { %624 = vrot.lane.b32.xlu1 %v3245_v24, %s2999_s30 }
 0x28f   :  { %v672_v38 = vpop.permute.xlu2 %671 }
 0x297   :  { %v662_v42 = vpop.permute.xlu2 %661 }
 0x29f   :  { %v676_v59 = vpop.permute.xlu2 %675 }
 0x2a3   :  { %v674_v43 = vpop.permute.xlu0 %673 }
 0x2a4   :  { %v683_v44 = vsel %vm636_vm13, %v662_v42, %v674_v43 }
 0x2a5   :  { %v691_v46 = vmul.f32 %v683_v44, %v130_v41  ;;  %v641_v44 = vmul.f32 %v3245_v24, %v127_v62 }
 0x2a7   :  { %v660_v47 = vpop.permute.xlu1 %659  ;;  %v695_v48 = vadd.f32 %v691_v46, %v687_v45  ;;  %v619_v10 = vpop.permute.xlu2 %618 }
 0x2a8   :  { %v682_v49 = vsel %vm636_vm13, %v660_v47, %v672_v38 }
 0x2a9   :  { %v690_v51 = vmul.f32 %v682_v49, %v130_v41  ;;  %v703_v52 = vpack.c.bf16 %v695_v48, %v695_v48 }
 0x2ab   :  { %v748_v53 = vsel %vm705_vm14, %v703_v52, 0  ;;  %v694_v55 = vadd.f32 %v690_v51, %v686_v50  ;;  %v617_v56 = vpop.permute.xlu0 %616 }
 0x2ac   :  { %757 = vmatpush.bf16.xpose.msra.mxu2 %v748_v53 }
 0x2ad   :  { %v702_v57 = vpack.c.bf16 %v694_v55, %v694_v55 }
 0x2af   :  { %v627_v60 = vpop.permute.xlu1 %626  ;;  %v729_v61 = vsel %vm705_vm14, %v702_v57, 0  ;;  %v670_v32 = vpop.permute.xlu2 %669 }
 0x2b0   :  { %v638_v63 = vsel %vm636_vm13, %v615_v39, %v627_v60  ;;  %738 = vmatpush.bf16.xpose.msra.mxu3 %v729_v61  ;;  %v173_v61 = vperm.slane %v3181_v5, 1 }
 0x2b1   :  { %v646_v1 = vmul.f32 %v638_v63, %v128_v58 }
 0x2b2   :  { %v242_v63 = vadd.f32 %v3184_v8, %v173_v61 }
 0x2b3   :  { %v650_v2 = vadd.f32 %v646_v1, %v642_v0  ;;  %v631_v4 = vpop.permute.xlu0 %630 }
 0x2b4   :  { %v640_v12 = vsel %vm636_vm13, %v619_v10, %v631_v4 }
 0x2b5   :  { %v698_v3 = vpack.c.bf16 %v650_v2, %v650_v2  ;;  %v648_v14 = vmul.f32 %v640_v12, %v128_v58 }
 0x2b7   :  { %v664_v6 = vpop.permute.xlu1 %663  ;;  %2564 = vmatmul.msk.bf16.vlgmr.msra.gmra.mxu3 %vm705_vm14, %v698_v3  ;;  %v652_v26 = vadd.f32 %v648_v14, %v644_v16 }
 0x2b8   :  { %v684_v7 = vsel %vm636_vm13, %v664_v6, %v676_v59 }
 0x2b9   :  { %v692_v11 = vmul.f32 %v684_v7, %v130_v41  ;;  %v700_v30 = vpack.c.bf16 %v652_v26, %v652_v26  ;;  %v500_v26 = vrot.slane %v242_v63, 4 }
 0x2bb   :  { %v696_v13 = vadd.f32 %v692_v11, %v688_v9  ;;  %v613_v39 = vpop.permute.xlu0 %612 }
 0x2bd   :  { %v704_v15 = vpack.c.bf16 %v696_v13, %v696_v13 }
 0x2bf   :  { %v629_v20 = vpop.permute.xlu1 %628  ;;  %v767_v17 = vsel %vm705_vm14, %v704_v15, 0 }
 0x2c0   :  { %v639_v23 = vsel %vm636_vm13, %v617_v56, %v629_v20  ;;  %776 = vmatpush.bf16.xpose.msrb.mxu3 %v767_v17 }
 0x2c1   :  { %v647_v27 = vmul.f32 %v639_v23, %v128_v58 }
 0x2c3   :  { %v651_v29 = vadd.f32 %v647_v27, %v643_v25 }
 0x2c5   :  { %v699_v31 = vpack.c.bf16 %v651_v29, %v651_v29 }
 0x2c7   :  { %v658_v33 = vpop.permute.xlu1 %657  ;;  %2565 = vmatmul.msk.bf16.vlgmr.msra.gmra.mxu2 %vm705_vm14, %v699_v31  ;;  %2566 = vmatmul.msk.bf16.vlgmr.msrb.gmra.mxu3 %vm705_vm14, %v700_v30 }
 0x2c8   :  { %v681_v19 = vsel %vm636_vm13, %v658_v33, %v670_v32 }
 0x2c9   :  { %v689_v35 = vmul.f32 %v681_v19, %v130_v41 }
 0x2cb   :  { %v693_v36 = vadd.f32 %v689_v35, %v685_v34 }
 0x2cd   :  { %v701_v38 = vpack.c.bf16 %v693_v36, %v693_v36 }
 0x2cf   :  { %v625_v22 = vpop.permute.xlu1 %624  ;;  %v710_v42 = vsel %vm705_vm14, %v701_v38, 0 }
 0x2d0   :  { %v637_v43 = vsel %vm636_vm13, %v613_v39, %v625_v22  ;;  %719 = vmatpush.bf16.xpose.msrb.mxu0 %v710_v42 }
 0x2d1   :  { %v645_v45 = vmul.f32 %v637_v43, %v128_v58 }
 0x2d3   :  { %v649_v46 = vadd.f32 %v645_v45, %v641_v44 }
 0x2d5   :  { %v697_v47 = vpack.c.bf16 %v649_v46, %v649_v46 }
 0x2d7   :  { %2563 = vmatmul.msk.bf16.vlgmr.msrb.gmra.mxu0 %vm705_vm14, %v697_v47 }
 0x33a   :  { %v740_v48 = vpop.f32.mrf.mxu3 }
 0x33b   :  { %v741_v24 = vadd.f32 %v740_v48, %v126_v37 }
 0x33d   :  { %v785_v59 = vsel %vm636_vm13, %v741_v24, -inf }
 0x342   :  { %v742_v49 = vpop.f32.mrf.mxu3 }
 0x34a   :  { %v759_v40 = vpop.f32.mrf.mxu2  ;;  %v778_v41 = vpop.f32.mrf.mxu3 }
 0x34b   :  { %v760_v50 = vadd.f32 %v759_v40, %v126_v37  ;;  %v779_v51 = vadd.f32 %v778_v41, %v126_v37 }
 0x34d   :  { %v788_v52 = vsel %vm636_vm13, %v760_v50, -inf  ;;  %v791_v53 = vsel %vm636_vm13, %v779_v51, -inf }
 0x34e   :  { %789 = vmax.xlane.f32.xlu2 %v788_v52  ;;  %792 = vmax.xlane.f32.xlu0 %v791_v53 }
 0x352   :  { %v761_v55 = vpop.f32.mrf.mxu2  ;;  %v780_v56 = vpop.f32.mrf.mxu3 }
 0x354   :  { %v721_v57 = vpop.f32.mrf.mxu0 }
 0x355   :  { %v722_v58 = vadd.f32 %v721_v57, %v126_v37 }
 0x356   :  { %786 = vmax.xlane.f32.xlu2 %v785_v59 }
 0x357   :  { %v782_v60 = vsel %vm636_vm13, %v722_v58, -inf }
 0x358   :  { %783 = vmax.xlane.f32.xlu1 %v782_v60 }
 0x35c   :  { %v723_v62 = vpop.f32.mrf.mxu0 }
 0x362   :  { %489 = vrot.lane.b32.xlu0 %v242_v63, %s2995_s11 }
 0x36e   :  { %492 = vrot.lane.b32.xlu2 %v242_v63, %s2994_s15 }
 0x371   :  { %495 = vrot.lane.b32.xlu1 %v242_v63, %s2993_s14 }
 0x3c1   :  { %v790_v0 = vpop.xlane.xlu2 %789  ;;  %v793_v1 = vpop.xlane.xlu0 %792 }
 0x3c2   :  { %v796_v2 = vsub.f32 %v760_v50, %v790_v0  ;;  %v797_v3 = vsub.f32 %v779_v51, %v793_v1 }
 0x3c4   :  { %v802_v4 = vmul.f32 1.442695, %v796_v2  ;;  %v804_v6 = vmul.f32 1.442695, %v797_v3 }
 0x3c6   :  { %2923 = vpow2.f32 %v802_v4 }
 0x3c7   :  { %2925 = vpow2.f32 %v804_v6 }
 0x3c9   :  { %v787_v7 = vpop.xlane.xlu2 %786 }
 0x3ca   :  { %v795_v9 = vsub.f32 %v741_v24, %v787_v7 }
 0x3cb   :  { %v784_v5 = vpop.xlane.xlu1 %783 }
 0x3cc   :  { %v3358_v10 = vpop.eup %2923  ;;  %v800_v8 = vmul.f32 1.442695, %v795_v9  ;;  %v794_v11 = vsub.f32 %v722_v58, %v784_v5 }
 0x3cd   :  { %v3360_v12 = vpop.eup %2925  ;;  %v812_v13 = vsel %vm636_vm13, %v3358_v10, 0.0 }
 0x3ce   :  { %2927 = vpow2.f32 %v800_v8  ;;  %v798_v14 = vmul.f32 1.442695, %v794_v11  ;;  %813 = vadd.xlane.f32.xlu0 %v812_v13  ;;  %v815_v15 = vsel %vm636_vm13, %v3360_v12, 0.0 }
 0x3cf   :  { %816 = vadd.xlane.f32.xlu2 %v815_v15 }
 0x3d0   :  { %2929 = vpow2.f32 %v798_v14 }
 0x3d1   :  { %v493_v25 = vpop.permute.xlu2 %492 }
 0x3d2   :  { %v498_v27 = vrot.slane %v493_v25, 4  ;;  %v501_v29 = vsel %vm256_vm12, %v493_v25, %v500_v26 }
 0x3d3   :  { %v509_v32 = vperm.slane %v501_v29, %v3192_v18 }
 0x3d4   :  { %v3366_v16 = vpop.eup %2927  ;;  %v490_v30 = vpop.permute.xlu0 %489  ;;  %v499_v31 = vsel %vm256_vm12, %v498_v27, %v242_v63 }
 0x3d5   :  { %v809_v20 = vsel %vm636_vm13, %v3366_v16, 0.0  ;;  %v512_v33 = vrot.slane %v490_v30, 4  ;;  %v505_v19 = vperm.slane %v499_v31, %v3192_v18  ;;  %v536_v38 = vrot.slane %v509_v32, 4 }
 0x3d6   :  { %v3370_v17 = vpop.eup %2929  ;;  %810 = vadd.xlane.f32.xlu0 %v809_v20 }
 0x3d7   :  { %v806_v23 = vsel %vm636_vm13, %v3370_v17, 0.0  ;;  %v524_v42 = vrot.slane %v505_v19, 4 }
 0x3d8   :  { %807 = vadd.xlane.f32.xlu1 %v806_v23 }
 0x3e3   :  { %v496_v34 = vpop.permute.xlu1 %495 }
 0x3e4   :  { %v510_v35 = vrot.slane %v496_v34, 4  ;;  %v513_v36 = vsel %vm256_vm12, %v496_v34, %v512_v33 }
 0x3e5   :  { %v521_v39 = vperm.slane %v513_v36, %v3192_v18 }
 0x3e6   :  { %v511_v22 = vsel %vm256_vm12, %v510_v35, %v490_v30 }
 0x3e7   :  { %v517_v43 = vperm.slane %v511_v22, %v3192_v18  ;;  %v534_v44 = vrot.slane %v521_v39, 4  ;;  %v537_v45 = vsel %vm256_vm12, %v521_v39, %v536_v38 }
 0x3e8   :  { %v545_v46 = vperm.slane %v537_v45, %v3198_v28 }
 0x3e9   :  { %v522_v47 = vrot.slane %v517_v43, 4  ;;  %v525_v48 = vsel %vm256_vm12, %v517_v43, %v524_v42  ;;  %v535_v49 = vsel %vm256_vm12, %v534_v44, %v509_v32 }
 0x3ea   :  { %v533_v37 = vperm.slane %v525_v48, %v3198_v28  ;;  %v541_v40 = vperm.slane %v535_v49, %v3198_v28  ;;  %v552_v41 = vrot.slane %v545_v46, 4 }
 0x3eb   :  { %v523_v50 = vsel %vm256_vm12, %v522_v47, %v505_v19 }
 0x3ec   :  { %v529_v51 = vperm.slane %v523_v50, %v3198_v28  ;;  %v548_v52 = vrot.slane %v533_v37, 4  ;;  %v550_v53 = vrot.slane %v541_v40, 4  ;;  %v553_v24 = vsel %vm256_vm12, 0.0, %v552_v41 }
 0x3ed   :  { %v565_v55 = vsel %vm256_vm12, %v552_v41, %v541_v40  ;;  %v570_v56 = vrot.slane %v553_v24, 4 }
 0x3ee   :  { %v546_v57 = vrot.slane %v529_v51, 4  ;;  %v549_v58 = vsel %vm256_vm12, 0.0, %v548_v52  ;;  %v551_v59 = vsel %vm256_vm12, 0.0, %v550_v53  ;;  %v569_v60 = vperm.slane %v565_v55, %v3192_v18 }
 0x3ef   :  { %v559_v61 = vrot.slane %v549_v58, 4  ;;  %v571_v62 = vsel %vm256_vm12, %v570_v56, %v551_v59  ;;  %v554_v63 = vsel %vm256_vm12, %v548_v52, %v529_v51 }
 0x3f0   :  { %v547_v0 = vsel %vm256_vm12, 0.0, %v546_v57  ;;  %v558_v1 = vperm.slane %v554_v63, %v3192_v18  ;;  %v575_v2 = vperm.slane %v571_v62, %v3192_v18  ;;  %v590_v3 = vrot.slane %v569_v60, 4 }
 0x3f1   :  { %v560_v4 = vsel %vm256_vm12, %v559_v61, %v547_v0 }
 0x3f2   :  { %v564_v6 = vperm.slane %v560_v4, %v3192_v18  ;;  %v578_v7 = vrot.slane %v558_v1, 4  ;;  %v588_v9 = vrot.slane %v575_v2, 4  ;;  %v591_v5 = vsel %vm256_vm12, %v575_v2, %v590_v3 }
 0x3f3   :  { %v599_v8 = vperm.slane %v591_v5, %v3198_v28 }
 0x3f4   :  { %v576_v11 = vrot.slane %v564_v6, 4  ;;  %v579_v13 = vsel %vm256_vm12, %v564_v6, %v578_v7  ;;  %v589_v14 = vsel %vm256_vm12, %v588_v9, %v569_v60 }
 0x3f5   :  { %v587_v15 = vperm.slane %v579_v13, %v3198_v28  ;;  %v604_v20 = vrot.slane %v599_v8, 4  ;;  %v595_v23 = vperm.slane %v589_v14, %v3198_v28 }
 0x3f6   :  { %v577_v25 = vsel %vm256_vm12, %v576_v11, %v558_v1 }
 0x3f7   :  { %v605_v26 = vsel %vm256_vm12, %v604_v20, %v587_v15  ;;  %v606_v27 = vrot.slane %v587_v15, 4  ;;  %v583_v29 = vperm.slane %v577_v25, %v3198_v28  ;;  %v600_v30 = vrot.slane %v595_v23, 4 }
 0x3f8   :  { %v832_v31 = vpack.c.bf16 %v605_v26, %v605_v26 }
 0x3f9   :  { %v601_v32 = vsel %vm256_vm12, %v600_v30, %v583_v29  ;;  %v607_v33 = vsel %vm256_vm12, %v599_v8, %v606_v27  ;;  %v602_v19 = vrot.slane %v583_v29, 4 }
 0x3fa   :  { %v876_v34 = vsel %vm118_vm3, %v832_v31, 0  ;;  %v830_v35 = vpack.c.bf16 %v601_v32, %v601_v32  ;;  %v833_v36 = vpack.c.bf16 %v607_v33, %v607_v33 }
 0x3fb   :  { %885 = vmatpush.bf16.msrb.mxu2 %v876_v34  ;;  %v603_v38 = vsel %vm256_vm12, %v595_v23, %v602_v19 }
 0x3fc   :  { %v838_v39 = vsel %vm118_vm3, %v830_v35, 0  ;;  %v895_v22 = vsel %vm118_vm3, %v833_v36, 0  ;;  %v831_v42 = vpack.c.bf16 %v603_v38, %v603_v38 }
 0x3fd   :  { %847 = vmatpush.bf16.msra.mxu0 %v838_v39  ;;  %904 = vmatpush.bf16.msra.mxu3 %v895_v22 }
 0x3fe   :  { %v857_v43 = vsel %vm118_vm3, %v831_v42, 0 }
 0x3ff   :  { %866 = vmatpush.bf16.msrb.mxu1 %v857_v43 }
 0x441   :  { %v814_v44 = vpop.xlane.xlu0 %813 }
 0x442   :  { %v817_v45 = vpop.xlane.xlu2 %816  ;;  %2931 = vrcp.f32 %v814_v44 }
 0x443   :  { %2933 = vrcp.f32 %v817_v45 }
 0x448   :  { %v2932_v46 = vpop.eup %2931 }
 0x449   :  { %v2934_v47 = vpop.eup %2933  ;;  %v824_v48 = vmul.f32 %v2932_v46, %v3358_v10  ;;  %v811_v49 = vpop.xlane.xlu0 %810 }
 0x44a   :  { %v825_v37 = vmul.f32 %v2934_v47, %v3360_v12  ;;  %2935 = vrcp.f32 %v811_v49 }
 0x44b   :  { %v808_v40 = vpop.xlane.xlu1 %807  ;;  %v828_v41 = vpack.c.bf16 %v824_v48, %v824_v48 }
 0x44c   :  { %v829_v50 = vpack.c.bf16 %v825_v37, %v825_v37  ;;  %2937 = vrcp.f32 %v808_v40 }
 0x44d   :  { %2569 = vmatmul.msk.bf16.vlgmr.msrb.gmra.mxu2 %vm636_vm13, %v828_v41 }
 0x44e   :  { %2570 = vmatmul.msk.bf16.vlgmr.msra.gmra.mxu3 %vm636_vm13, %v829_v50 }
 0x450   :  { %v2936_v51 = vpop.eup %2935 }
 0x451   :  { %v823_v52 = vmul.f32 %v2936_v51, %v3366_v16 }
 0x452   :  { %v2938_v53 = vpop.eup %2937 }
 0x453   :  { %v822_v24 = vmul.f32 %v2938_v53, %v3370_v17  ;;  %v827_v55 = vpack.c.bf16 %v823_v52, %v823_v52 }
 0x455   :  { %v826_v10 = vpack.c.bf16 %v822_v24, %v822_v24  ;;  %2568 = vmatmul.msk.bf16.vlgmr.msrb.gmra.mxu1 %vm636_vm13, %v827_v55 }
 0x457   :  { %2567 = vmatmul.msk.bf16.vlgmr.msra.gmra.mxu0 %vm636_vm13, %v826_v10 }
 0x4d0   :  { %v887_v12 = vpop.f32.mrf.mxu2 }
 0x4d1   :  { %v906_v56 = vpop.f32.mrf.mxu3  ;;  %v910_v59 = vrot.slane %v887_v12, 4 }
 0x4d2   :  { %v922_v57 = vrot.slane %v906_v56, 4  ;;  %v868_v58 = vpop.f32.mrf.mxu1 }
 0x4d3   :  { %v924_v60 = vrot.slane %v868_v58, 4 }
 0x4d4   :  { %v923_v61 = vsel %vm256_vm12, %v922_v57, %v868_v58  ;;  %v849_v62 = vpop.f32.mrf.mxu0 }
 0x4d5   :  { %v925_v16 = vsel %vm256_vm12, %v906_v56, %v924_v60  ;;  %v929_v63 = vperm.slane %v923_v61, %v3192_v18  ;;  %v911_v17 = vsel %vm256_vm12, %v910_v59, %v849_v62  ;;  %v912_v0 = vrot.slane %v849_v62, 4 }
 0x4d6   :  { %v933_v1 = vperm.slane %v925_v16, %v3192_v18  ;;  %v917_v2 = vperm.slane %v911_v17, %v3192_v18  ;;  %v2852_v17 = vld [vmem:[%s4046_s10 + $0x18] sm:$0xff] }
 0x4d7   :  { %v934_v3 = vrot.slane %v929_v63, 4  ;;  %v913_v4 = vsel %vm256_vm12, %v887_v12, %v912_v0  ;;  %1077 = vmatpush.bf16.msrb.mxu0 %v2852_v17  ;;  %v2851_v0 = vld [vmem:[%s4046_s10 + $0x10] sm:$0xff]  ;;  %v2861_v17 = vld [vmem:[%s4064_s24] sm:$0xff] }
 0x4d8   :  { %v946_v6 = vrot.slane %v933_v1, 4  ;;  %v921_v7 = vperm.slane %v913_v4, %v3192_v18  ;;  %v936_v9 = vrot.slane %v917_v2, 4  ;;  %v889_v5 = vpop.f32.mrf.mxu2 }
 0x4d9   :  { %v935_v8 = vsel %vm256_vm12, %v934_v3, %v917_v2  ;;  %v908_v11 = vpop.f32.mrf.mxu3  ;;  %v2849_v2 = vld [vmem:[%s4046_s10] sm:$0xff] }
 0x4da   :  { %v937_v13 = vsel %vm256_vm12, %v929_v63, %v936_v9  ;;  %v941_v14 = vperm.slane %v935_v8, %v3198_v28  ;;  %v947_v15 = vsel %vm256_vm12, %v946_v6, %v921_v7  ;;  %v948_v20 = vrot.slane %v921_v7, 4  ;;  %v870_v23 = vpop.f32.mrf.mxu1 }
 0x4db   :  { %v945_v25 = vperm.slane %v937_v13, %v3198_v28  ;;  %v953_v26 = vperm.slane %v947_v15, %v3198_v28  ;;  %1078 = vmatpush.bf16.msrb.mxu0 %v2851_v0  ;;  %v2614_v23 = vld [vmem:[%s4048_s12 + $0x30] sm:$0xf] }
 0x4dc   :  { %v949_v27 = vsel %vm256_vm12, %v933_v1, %v948_v20  ;;  %v851_v29 = vpop.f32.mrf.mxu0  ;;  %v958_v31 = vrot.slane %v941_v14, 4  ;;  %v2850_v1 = vld [vmem:[%s4046_s10 + $0x8] sm:$0xff] }
 0x4dd   :  { %v957_v30 = vperm.slane %v949_v27, %v3198_v28  ;;  %v960_v32 = vrot.slane %v945_v25, 4  ;;  %v962_v19 = vrot.slane %v953_v26, 4  ;;  %v2860_v25 = vld [vmem:[%s4048_s12 + $0x34] sm:$0xf0]  ;;  %v2616_v27 = vld [vmem:[%s4048_s12 + $0x38] sm:$0xf0] }
 0x4de   :  { %v959_v39 = vsel %vm256_vm12, 0.0, %v958_v31  ;;  %v2858_v31 = vld [vmem:[%s4048_s12 + $0x24] sm:$0xf0] }
 0x4df   :  { %v961_v33 = vsel %vm256_vm12, 0.0, %v960_v32  ;;  %v964_v34 = vrot.slane %v957_v30, 4  ;;  %v966_v35 = vsel %vm256_vm12, %v960_v32, %v941_v14  ;;  %v963_v47 = vsel %vm256_vm12, 0.0, %v962_v19  ;;  %1079 = vmatpush.bf16.msrb.mxu0 %v2850_v1  ;;  %v2606_v30 = vld [vmem:[%s4048_s12 + $0x20] sm:$0xf] }
 0x4e0   :  { %v970_v36 = vperm.slane %v966_v35, %v3192_v18  ;;  %v971_v38 = vrot.slane %v961_v33, 4  ;;  %v2857_v32 = vld [vmem:[%s4048_s12 + $0x24] sm:$0xf]  ;;  %v2607_v33 = vor.u32 %v2858_v31, %v2606_v30  ;;  %v2608_v19 = vld [vmem:[%s4048_s12 + $0x28] sm:$0xf0] }
 0x4e1   :  { %v965_v22 = vsel %vm256_vm12, 0.0, %v964_v34  ;;  %v977_v42 = vsel %vm256_vm12, %v964_v34, %v953_v26  ;;  %v2615_v26 = vor.u32 %v2860_v25, %v2614_v23  ;;  %v2611_v34 = vor.u32 %v2857_v32, %v2608_v19  ;;  %v2598_v35 = vld [vmem:[%s4048_s12 + $0x10] sm:$0xf] }
 0x4e2   :  { %v972_v43 = vsel %vm256_vm12, %v971_v38, %v959_v39  ;;  %v981_v44 = vperm.slane %v977_v42, %v3192_v18  ;;  %v982_v45 = vrot.slane %v965_v22, 4  ;;  %v990_v46 = vrot.slane %v970_v36, 4  ;;  %v2855_v38 = vld [vmem:[%s4048_s12 + $0x14] sm:$0xf]  ;;  %v2600_v22 = vld [vmem:[%s4048_s12 + $0x18] sm:$0xf0] }
 0x4e3   :  { %v976_v48 = vperm.slane %v972_v43, %v3192_v18  ;;  %1080 = vmatpush.bf16.msrb.mxu0 %v2849_v2  ;;  %1165 = vmatpush.bf16.msra.mxu1 %v2615_v26  ;;  %v2603_v42 = vor.u32 %v2855_v38, %v2600_v22  ;;  %v2590_v43 = vld [vmem:[%s4048_s12] sm:$0xf]  ;;  %v2693_v38 = vld [vmem:[%s4044_s8 + $0x78] sm:$0xf0] }
 0x4e4   :  { %v983_v49 = vsel %vm256_vm12, %v982_v45, %v963_v47  ;;  %v1002_v37 = vrot.slane %v981_v44, 4  ;;  %v2853_v45 = vld [vmem:[%s4048_s12 + $0x4] sm:$0xf]  ;;  %v2592_v47 = vld [vmem:[%s4048_s12 + $0x8] sm:$0xf0] }
 0x4e5   :  { %v987_v40 = vperm.slane %v983_v49, %v3192_v18  ;;  %v991_v41 = vsel %vm256_vm12, %v976_v48, %v990_v46  ;;  %v988_v50 = vrot.slane %v976_v48, 4  ;;  %v2595_v48 = vor.u32 %v2853_v45, %v2592_v47  ;;  %v2683_v22 = vld [vmem:[%s4044_s8 + $0x60] sm:$0xf]  ;;  %v2685_v45 = vld [vmem:[%s4044_s8 + $0x68] sm:$0xf0] }
 0x4e6   :  { %v999_v51 = vperm.slane %v991_v41, %v3198_v28  ;;  %v2675_v47 = vld [vmem:[%s4044_s8 + $0x50] sm:$0xf] }
 0x4e7   :  { %v1003_v52 = vsel %vm256_vm12, %v987_v40, %v1002_v37  ;;  %v989_v53 = vsel %vm256_vm12, %v988_v50, %v970_v36  ;;  %v1000_v24 = vrot.slane %v987_v40, 4  ;;  %1166 = vmatpush.bf16.msra.mxu1 %v2607_v33  ;;  %v2856_v36 = vld [vmem:[%s4048_s12 + $0x14] sm:$0xf0] }
 0x4e8   :  { %v1011_v55 = vperm.slane %v1003_v52, %v3198_v28  ;;  %v1018_v10 = vrot.slane %v999_v51, 4  ;;  %v995_v12 = vperm.slane %v989_v53, %v3198_v28  ;;  %v2599_v39 = vor.u32 %v2856_v36, %v2598_v35  ;;  %v2876_v35 = vld [vmem:[%s4044_s8 + $0x74] sm:$0xf0] }
 0x4e9   :  { %v1001_v56 = vsel %vm256_vm12, %v1000_v24, %v981_v44  ;;  %v2854_v44 = vld [vmem:[%s4048_s12 + $0x4] sm:$0xf0] }
 0x4ea   :  { %v1019_v57 = vsel %vm256_vm12, %v1011_v55, %v1018_v10  ;;  %v1016_v58 = vrot.slane %v1011_v55, 4  ;;  %v1007_v59 = vperm.slane %v1001_v56, %v3198_v28  ;;  %v1014_v60 = vrot.slane %v995_v12, 4  ;;  %v2915_v55 = vld [vmem:[%s4063_s21] ss:$0 sm:$0xff] }
 0x4eb   :  { %1029 = vrot.lane.b32.xlu1 %v1019_v57, %s3000_s17  ;;  %1167 = vmatpush.bf16.msra.mxu1 %v2599_v39  ;;  %v2591_v46 = vor.u32 %v2854_v44, %v2590_v43  ;;  %v2873_v43 = vld [vmem:[%s4044_s8 + $0x64] sm:$0xf] }
 0x4ec   :  { %v1017_v61 = vsel %vm256_vm12, %v1016_v58, %v999_v51  ;;  %v1012_v62 = vrot.slane %v1007_v59, 4  ;;  %v1015_v16 = vsel %vm256_vm12, %v1007_v59, %v1014_v60  ;;  %v2868_v58 = vld [vmem:[%s4064_s24 + $0x38] sm:$0xff]  ;;  %v2867_v59 = vld [vmem:[%s4064_s24 + $0x30] sm:$0xff]  ;;  %v2866_v60 = vld [vmem:[%s4064_s24 + $0x28] sm:$0xff] }
 0x4ed   :  { %1025 = vrot.lane.b32.xlu0 %v1017_v61, %s3001_s16  ;;  %1021 = vrot.lane.b32.xlu2 %v1015_v16, %s3002_s27  ;;  %v2865_v61 = vld [vmem:[%s4064_s24 + $0x20] sm:$0xff]  ;;  %v2863_v16 = vld [vmem:[%s4064_s24 + $0x10] sm:$0xff] }
 0x4ee   :  { %v1013_v63 = vsel %vm256_vm12, %v1012_v62, %v995_v12  ;;  %1273 = vmatpush.bf16.msrb.mxu3 %v2868_v58  ;;  %v2864_v62 = vld [vmem:[%s4064_s24 + $0x18] sm:$0xff] }
 0x4ef   :  { %1168 = vmatpush.bf16.msra.mxu1 %v2591_v46  ;;  %v2688_v46 = vor.u32 %v2873_v43, %v2685_v45 }
 0x4f2   :  { %1274 = vmatpush.bf16.msrb.mxu3 %v2867_v59 }
 0x4f6   :  { %1275 = vmatpush.bf16.msrb.mxu3 %v2866_v60 }
 0x4fa   :  { %1276 = vmatpush.bf16.msrb.mxu3 %v2865_v61 }
 0x4fe   :  { %1277 = vmatpush.bf16.msrb.mxu3 %v2864_v62 }
 0x502   :  { %1278 = vmatpush.bf16.msrb.mxu3 %v2863_v16  ;;  %v2916_v16 = vld [vmem:[%s4043_s7 + $0x1] ss:$0 sm:$0xff] }
 0x547   :  { %v1022_v3 = vpop.permute.xlu2 %1021 }
 0x548   :  { %v1032_v4 = vsel %vm705_vm14, %v1013_v63, %v1022_v3  ;;  %v2862_v63 = vld [vmem:[%s4064_s24 + $0x8] sm:$0xff] }
 0x549   :  { %1279 = vmatpush.bf16.msrb.mxu3 %v2862_v63 }
 0x54d   :  { %1280 = vmatpush.bf16.msrb.mxu3 %v2861_v17 }
 0x55d   :  { %v1030_v7 = vpop.permute.xlu1 %1029 }
 0x55f   :  { %v1026_v6 = vpop.permute.xlu0 %1025 }
 0x560   :  { %v1034_v9 = vsel %vm1033_vm15, %v1032_v4, %v1026_v6 }
 0x561   :  { %v1036_v5 = vsel %vm1035_vm0, %v1034_v9, %v1030_v7 }
 0x562   :  { %v1037_v8 = vpack.c.bf16 %v1036_v5, %v1036_v5 }
 0x564   :  { %2587 = vmatmul.msk.bf16.vlgmr.msrb.gmra.mxu0 %vm133_vm7, %v1037_v8 }
 0x5e1   :  { %v1082_v11 = vpop.f32.mrf.mxu0 }
 0x5e2   :  { %v3486_v13 = vadd.f32 %v1082_v11, %v3116_v21  ;;  %v2859_v21 = vld [vmem:[%s4048_s12 + $0x34] sm:$0xf] }
 0x5e3   :  { %v2619_v29 = vor.u32 %v2859_v21, %v2616_v27 }
 0x5e4   :  { %v1088_v14 = vmul.f32 %v3486_v13, %v3486_v13 }
 0x5e5   :  { %1178 = vmatpush.bf16.msra.mxu2 %v2619_v29 }
 0x5e6   :  { %v1089_v15 = vsel %vm133_vm7, %v1088_v14, 0.0 }
 0x5e7   :  { %1090 = vadd.xlane.f32.xlu0 %v1089_v15 }
 0x5e9   :  { %v1084_v20 = vpop.f32.mrf.mxu0  ;;  %1179 = vmatpush.bf16.msra.mxu2 %v2611_v34  ;;  %v2691_v34 = vld [vmem:[%s4044_s8 + $0x70] sm:$0xf] }
 0x5ea   :  { %v2692_v36 = vor.u32 %v2876_v35, %v2691_v34 }
 0x5ec   :  { %1374 = vmatpush.bf16.msra.mxu0 %v2692_v36 }
 0x5ed   :  { %1180 = vmatpush.bf16.msra.mxu2 %v2603_v42  ;;  %v2874_v42 = vld [vmem:[%s4044_s8 + $0x64] sm:$0xf0] }
 0x5ee   :  { %v2684_v44 = vor.u32 %v2874_v42, %v2683_v22 }
 0x5f0   :  { %1375 = vmatpush.bf16.msra.mxu0 %v2684_v44 }
 0x5f1   :  { %1181 = vmatpush.bf16.msra.mxu2 %v2595_v48  ;;  %v2872_v48 = vld [vmem:[%s4044_s8 + $0x54] sm:$0xf0] }
 0x65a   :  { %v1091_v49 = vpop.xlane.xlu0 %1090 }
 0x65b   :  { %v1092_v37 = vmul.f32 %v1091_v49, %v3169_v54  ;;  %v2871_v49 = vld [vmem:[%s4044_s8 + $0x54] sm:$0xf] }
 0x65d   :  { %v1093_v40 = vadd.f32 1e-06, %v1092_v37  ;;  %v2676_v37 = vor.u32 %v2872_v48, %v2675_v47 }
 0x65f   :  { %2939 = vrsqrt.f32 %v1093_v40  ;;  %vm1100_vm2 = vweird.f32 %v1093_v40  ;;  %1376 = vmatpush.bf16.msra.mxu0 %v2676_v37 }
 0x665   :  { %v2940_v41 = vpop.eup %2939 }
 0x666   :  { %v1095_v50 = vmul.f32 %v2940_v41, %v1093_v40  ;;  %vm1101_vm1 = vweird.f32 %v2940_v41  ;;  %v2677_v40 = vld [vmem:[%s4044_s8 + $0x58] sm:$0xf0] }
 0x667   :  { %vm1102_vm4 = vmor %vm1100_vm2, %vm1101_vm1 }
 0x668   :  { %v1096_v51 = vmul.f32 %v2940_v41, %v1095_v50  ;;  %v2667_v50 = vld [vmem:[%s4044_s8 + $0x40] sm:$0xf] }
 0x66a   :  { %v1097_v52 = vmul.f32 0.5, %v1096_v51  ;;  %v2870_v51 = vld [vmem:[%s4044_s8 + $0x44] sm:$0xf0] }
 0x66c   :  { %v1098_v53 = vsub.f32 1.5, %v1097_v52  ;;  %v2869_v52 = vld [vmem:[%s4044_s8 + $0x44] sm:$0xf] }
 0x66e   :  { %v1099_v24 = vmul.f32 %v2940_v41, %v1098_v53  ;;  %v2668_v53 = vor.u32 %v2870_v51, %v2667_v50 }
 0x670   :  { %v1103_v10 = vsel %vm1102_vm4, %v2940_v41, %v1099_v24  ;;  %v2680_v41 = vor.u32 %v2871_v49, %v2677_v40  ;;  %v2669_v24 = vld [vmem:[%s4044_s8 + $0x48] sm:$0xf0]  ;;  %1377 = vmatpush.bf16.msra.mxu0 %v2668_v53 }
 0x671   :  { %v1104_v12 = vmul.f32 %v1103_v10, %v3486_v13 }
 0x673   :  { %v1108_v56 = vmul.f32 %v2915_v55, %v1104_v12  ;;  %v2672_v55 = vor.u32 %v2869_v52, %v2669_v24 }
 0x675   :  { %v1109_v57 = vpack.c.bf16 %v1108_v56, %v1108_v56 }
 0x677   :  { %2620 = vmatmul.msk.bf16.vlgmr.msra.gmra.mxu1 %vm133_vm7, %v1109_v57  ;;  %2621 = vmatmul.msk.bf16.vlgmr.msra.gmra.mxu2 %vm133_vm7, %v1109_v57 }
 0x6f4   :  { %v1170_v0 = vpop.f32.mrf.mxu1 }
 0x6f5   :  { %v2622_v1 = vmul.f32 -1.442695, %v1170_v0 }
 0x6f7   :  { %2941 = vpow2.f32 %v2622_v1 }
 0x6fa   :  { %v1183_v2 = vpop.f32.mrf.mxu2 }
 0x6fc   :  { %v1172_v3 = vpop.f32.mrf.mxu1 }
 0x6fd   :  { %v2942_v4 = vpop.eup %2941 }
 0x6fe   :  { %v1190_v6 = vadd.f32 1.0, %v2942_v4 }
 0x700   :  { %2943 = vrcp.f32 %v1190_v6  ;;  %v1202_v11 = vand.u32 2147483648, %v1190_v6  ;;  %v1200_v15 = vand.u32 2147483647, %v1190_v6  ;;  %vm1196_vm6 = vweird.f32 %v1190_v6 }
 0x702   :  { %v1185_v7 = vpop.f32.mrf.mxu2  ;;  %v1203_v23 = vor.u32 1.1754944e-38, %v1202_v11  ;;  %vm1201_vm9 = vcmp.eq.f32.partialorder %v1200_v15, 8.507059e+37 }
 0x706   :  { %v2944_v9 = vpop.eup %2943 }
 0x707   :  { %v1192_v5 = vmul.f32 %v2944_v9, %v1190_v6  ;;  %vm1197_vm5 = vweird.f32 %v2944_v9 }
 0x708   :  { %vm1198_vm8 = vmor %vm1196_vm6, %vm1197_vm5 }
 0x709   :  { %v1193_v8 = vsub.f32 1.0, %v1192_v5 }
 0x70b   :  { %v1194_v14 = vmul.f32 %v2944_v9, %v1193_v8 }
 0x70d   :  { %v1195_v20 = vadd.f32 %v2944_v9, %v1194_v14 }
 0x70f   :  { %v1199_v25 = vsel %vm1198_vm8, %v2944_v9, %v1195_v20 }
 0x710   :  { %v1204_v21 = vsel %vm1201_vm9, %v1203_v23, %v1199_v25 }
 0x711   :  { %v1206_v26 = vmul.f32 %v1204_v21, %v1170_v0 }
 0x713   :  { %v1207_v27 = vmul.f32 %v1206_v26, %v1183_v2  ;;  %v3634_v2 = vld [vmem:[%s4045_s9 + $0x2] sm:$0x3] }
 0x714   :  { %v1323_v3 = vperm.slane %v3634_v2, 0 }
 0x715   :  { %v1208_v29 = vpack.c.bf16 %v1207_v27, %v1207_v27 }
 0x717   :  { %1281 = vmatmul.bf16.vlgmr.msrb.gmra.mxu3 %v1208_v29 }
 0x79a   :  { %v1282_v30 = vpop.f32.mrf.mxu3 }
 0x79b   :  { %v3571_v31 = vadd.f32 %v1282_v30, %v3486_v13  ;;  %v2875_v13 = vld [vmem:[%s4044_s8 + $0x74] sm:$0xf] }
 0x79c   :  { %v2696_v39 = vor.u32 %v2875_v13, %v2693_v38 }
 0x79d   :  { %v1289_v32 = vmul.f32 %v3571_v31, %v3571_v31 }
 0x79e   :  { %1387 = vmatpush.bf16.msrb.mxu1 %v2696_v39 }
 0x79f   :  { %v1290_v33 = vsel %vm133_vm7, %v1289_v32, 0.0 }
 0x7a0   :  { %1291 = vadd.xlane.f32.xlu2 %v1290_v33 }
 0x7a2   :  { %v1284_v19 = vpop.f32.mrf.mxu3  ;;  %1388 = vmatpush.bf16.msrb.mxu1 %v2688_v46 }
 0x7a6   :  { %1389 = vmatpush.bf16.msrb.mxu1 %v2680_v41 }
 0x7aa   :  { %1390 = vmatpush.bf16.msrb.mxu1 %v2672_v55 }
 0x813   :  { %v1292_v10 = vpop.xlane.xlu2 %1291 }
 0x814   :  { %v1293_v12 = vmul.f32 %v1292_v10, %v3169_v54 }
 0x816   :  { %v1294_v56 = vadd.f32 1e-06, %v1293_v12 }
 0x818   :  { %2945 = vrsqrt.f32 %v1294_v56  ;;  %vm1301_vm11 = vweird.f32 %v1294_v56 }
 0x81e   :  { %v2946_v57 = vpop.eup %2945 }
 0x81f   :  { %v1296_v58 = vmul.f32 %v2946_v57, %v1294_v56  ;;  %vm1302_vm10 = vweird.f32 %v2946_v57 }
 0x820   :  { %vm1303_vm1 = vmor %vm1301_vm11, %vm1302_vm10 }
 0x821   :  { %v1297_v59 = vmul.f32 %v2946_v57, %v1296_v58 }
 0x823   :  { %v1298_v60 = vmul.f32 0.5, %v1297_v59 }
 0x825   :  { %v1299_v61 = vsub.f32 1.5, %v1298_v60 }
 0x827   :  { %v1300_v62 = vmul.f32 %v2946_v57, %v1299_v61 }
 0x829   :  { %v1304_v63 = vsel %vm1303_vm1, %v2946_v57, %v1300_v62 }
 0x82a   :  { %v1305_v17 = vmul.f32 %v1304_v63, %v3571_v31 }
 0x82c   :  { %v1309_v0 = vmul.f32 %v2916_v16, %v1305_v17 }
 0x82e   :  { %v1310_v1 = vpack.c.bf16 %v1309_v0, %v1309_v0 }
 0x830   :  { %2697 = vmatmul.msk.bf16.vlgmr.msra.gmra.mxu0 %vm133_vm7, %v1310_v1  ;;  %2698 = vmatmul.msk.bf16.vlgmr.msrb.gmra.mxu1 %vm133_vm7, %v1310_v1 }
 0x8ad   :  { %v1379_v4 = vpop.f32.mrf.mxu0  ;;  %v3637_v6 = vpop.f32.mrf.mxu1 }
 0x8ae   :  { %v1380_v7 = vadd.f32 %v1379_v4, %v1323_v3 }
 0x8b0   :  { %1397 = vrot.lane.b32.xlu1 %v1380_v7, %s2995_s11  ;;  %v1408_v15 = vrot.slane %v1380_v7, 4 }
 0x8b5   :  { %v1381_v9 = vpop.f32.mrf.mxu0  ;;  %v1394_v5 = vpop.f32.mrf.mxu1 }
 0x8b8   :  { %1400 = vrot.lane.b32.xlu1 %v1380_v7, %s2994_s15 }
 0x8c0   :  { %1403 = vrot.lane.b32.xlu1 %v1380_v7, %s2993_s14 }
 0x8c8   :  { %1516 = vrot.lane.b32.xlu1 %v1380_v7, %s2992_s13 }
 0x922   :  { %v1398_v8 = vpop.permute.xlu1 %1397 }
 0x923   :  { %1518 = vrot.lane.b32.xlu1 %v1398_v8, %s2992_s13  ;;  %v1420_v21 = vrot.slane %v1398_v8, 4 }
 0x92a   :  { %v1401_v11 = vpop.permute.xlu1 %1400 }
 0x92b   :  { %v1406_v14 = vrot.slane %v1401_v11, 4  ;;  %1520 = vrot.lane.b32.xlu0 %v1401_v11, %s2992_s13  ;;  %v1409_v20 = vsel %vm256_vm12, %v1401_v11, %v1408_v15 }
 0x92c   :  { %v1417_v25 = vperm.slane %v1409_v20, %v3192_v18 }
 0x92d   :  { %v1407_v23 = vsel %vm256_vm12, %v1406_v14, %v1380_v7 }
 0x92e   :  { %v1413_v26 = vperm.slane %v1407_v23, %v3192_v18  ;;  %v1444_v32 = vrot.slane %v1417_v25, 4 }
 0x930   :  { %v1432_v34 = vrot.slane %v1413_v26, 4 }
 0x932   :  { %v1404_v27 = vpop.permute.xlu1 %1403 }
 0x933   :  { %v1418_v29 = vrot.slane %v1404_v27, 4  ;;  %v1421_v30 = vsel %vm256_vm12, %v1404_v27, %v1420_v21  ;;  %1522 = vrot.lane.b32.xlu2 %v1404_v27, %s2992_s13 }
 0x934   :  { %v1429_v33 = vperm.slane %v1421_v30, %v3192_v18 }
 0x935   :  { %v1419_v19 = vsel %vm256_vm12, %v1418_v29, %v1398_v8 }
 0x936   :  { %v1425_v35 = vperm.slane %v1419_v19, %v3192_v18  ;;  %v1442_v13 = vrot.slane %v1429_v33, 4  ;;  %v1445_v36 = vsel %vm256_vm12, %v1429_v33, %v1444_v32 }
 0x937   :  { %v1453_v38 = vperm.slane %v1445_v36, %v3198_v28 }
 0x938   :  { %v1430_v39 = vrot.slane %v1425_v35, 4  ;;  %v1433_v22 = vsel %vm256_vm12, %v1425_v35, %v1432_v34  ;;  %v1443_v42 = vsel %vm256_vm12, %v1442_v13, %v1417_v25 }
 0x939   :  { %v1441_v43 = vperm.slane %v1433_v22, %v3198_v28  ;;  %v1449_v44 = vperm.slane %v1443_v42, %v3198_v28  ;;  %v1460_v45 = vrot.slane %v1453_v38, 4 }
 0x93a   :  { %v1431_v46 = vsel %vm256_vm12, %v1430_v39, %v1413_v26  ;;  %v1517_v21 = vpop.permute.xlu1 %1516 }
 0x93b   :  { %v1437_v47 = vperm.slane %v1431_v46, %v3198_v28  ;;  %v1456_v48 = vrot.slane %v1441_v43, 4  ;;  %v1458_v49 = vrot.slane %v1449_v44, 4  ;;  %v1461_v37 = vsel %vm256_vm12, 0.0, %v1460_v45 }
 0x93c   :  { %v1478_v40 = vrot.slane %v1461_v37, 4  ;;  %v1473_v41 = vsel %vm256_vm12, %v1460_v45, %v1449_v44  ;;  %v1530_v34 = vrot.slane %v1517_v21, 4 }
 0x93d   :  { %v1454_v50 = vrot.slane %v1437_v47, 4  ;;  %v1457_v51 = vsel %vm256_vm12, 0.0, %v1456_v48  ;;  %v1459_v52 = vsel %vm256_vm12, 0.0, %v1458_v49  ;;  %v1462_v53 = vsel %vm256_vm12, %v1456_v48, %v1437_v47 }
 0x93e   :  { %v1467_v24 = vrot.slane %v1457_v51, 4  ;;  %v1466_v55 = vperm.slane %v1462_v53, %v3192_v18  ;;  %v1477_v10 = vperm.slane %v1473_v41, %v3192_v18  ;;  %v1479_v12 = vsel %vm256_vm12, %v1478_v40, %v1459_v52 }
 0x93f   :  { %v1455_v56 = vsel %vm256_vm12, 0.0, %v1454_v50  ;;  %v1483_v57 = vperm.slane %v1479_v12, %v3192_v18 }
 0x940   :  { %v1468_v58 = vsel %vm256_vm12, %v1467_v24, %v1455_v56  ;;  %v1486_v59 = vrot.slane %v1466_v55, 4  ;;  %v1498_v60 = vrot.slane %v1477_v10, 4 }
 0x941   :  { %v1472_v61 = vperm.slane %v1468_v58, %v3192_v18  ;;  %v1496_v62 = vrot.slane %v1483_v57, 4 }
 0x942   :  { %v1499_v16 = vsel %vm256_vm12, %v1483_v57, %v1498_v60 }
 0x943   :  { %v1484_v63 = vrot.slane %v1472_v61, 4  ;;  %v1497_v17 = vsel %vm256_vm12, %v1496_v62, %v1477_v10  ;;  %v1487_v0 = vsel %vm256_vm12, %v1472_v61, %v1486_v59  ;;  %v1507_v1 = vperm.slane %v1499_v16, %v3198_v28 }
 0x944   :  { %v1503_v3 = vperm.slane %v1497_v17, %v3198_v28  ;;  %v1495_v4 = vperm.slane %v1487_v0, %v3198_v28 }
 0x945   :  { %v1485_v7 = vsel %vm256_vm12, %v1484_v63, %v1466_v55  ;;  %v1512_v9 = vrot.slane %v1507_v1, 4 }
 0x946   :  { %v1491_v5 = vperm.slane %v1485_v7, %v3198_v28  ;;  %v1508_v8 = vrot.slane %v1503_v3, 4  ;;  %v1514_v11 = vrot.slane %v1495_v4, 4 }
 0x947   :  { %v3683_v14 = vsel %vm256_vm12, %v1512_v9, %v1495_v4 }
 0x948   :  { %v3686_v15 = vsel %vm256_vm12, %v1508_v8, %v1491_v5  ;;  %v3689_v20 = vsel %vm256_vm12, %v1507_v1, %v1514_v11  ;;  %v1510_v23 = vrot.slane %v1491_v5, 4 }
 0x949   :  { %1762 = vrot.lane.b32.xlu0 %v3686_v15, %s2998_s29 }
 0x94a   :  { %v3694_v25 = vsel %vm256_vm12, %v1503_v3, %v1510_v23 }
 0x98d   :  { %v1523_v26 = vpop.permute.xlu2 %1522 }
 0x98e   :  { %v1540_v30 = vrot.slane %v1523_v26, 4 }
 0x995   :  { %v1519_v27 = vpop.permute.xlu1 %1518 }
 0x996   :  { %v1542_v29 = vrot.slane %v1519_v27, 4  ;;  %v1541_v33 = vsel %vm256_vm12, %v1540_v30, %v1519_v27 }
 0x997   :  { %v1547_v35 = vperm.slane %v1541_v33, %v3192_v18 }
 0x998   :  { %v1543_v32 = vsel %vm256_vm12, %v1523_v26, %v1542_v29 }
 0x999   :  { %v1551_v19 = vperm.slane %v1543_v32, %v3192_v18  ;;  %v1552_v43 = vrot.slane %v1547_v35, 4 }
 0x99b   :  { %v1564_v39 = vrot.slane %v1551_v19, 4 }
 0x99d   :  { %v1521_v13 = vpop.permute.xlu0 %1520 }
 0x99e   :  { %v1528_v36 = vrot.slane %v1521_v13, 4  ;;  %v1531_v38 = vsel %vm256_vm12, %v1521_v13, %v1530_v34 }
 0x99f   :  { %v1539_v22 = vperm.slane %v1531_v38, %v3192_v18 }
 0x9a0   :  { %v1529_v42 = vsel %vm256_vm12, %v1528_v36, %v1517_v21 }
 0x9a1   :  { %v1535_v44 = vperm.slane %v1529_v42, %v3192_v18  ;;  %v1565_v45 = vsel %vm256_vm12, %v1564_v39, %v1539_v22  ;;  %v1566_v46 = vrot.slane %v1539_v22, 4 }
 0x9a2   :  { %v1571_v47 = vperm.slane %v1565_v45, %v3198_v28 }
 0x9a3   :  { %v1553_v48 = vsel %vm256_vm12, %v1552_v43, %v1535_v44  ;;  %v1554_v49 = vrot.slane %v1535_v44, 4  ;;  %v1567_v37 = vsel %vm256_vm12, %v1551_v19, %v1566_v46  ;;  %v2971_v44 = vld [vmem:[%s4040_s4] sm:$0xff] }
 0x9a4   :  { %v1559_v40 = vperm.slane %v1553_v48, %v3198_v28  ;;  %v1575_v41 = vperm.slane %v1567_v37, %v3198_v28  ;;  %v1580_v52 = vrot.slane %v1571_v47, 4  ;;  %v2972_v46 = vld [vmem:[%s4039_s3] sm:$0xff] }
 0x9a5   :  { %v1555_v50 = vsel %vm256_vm12, %v1547_v35, %v1554_v49 }
 0x9a6   :  { %v1563_v51 = vperm.slane %v1555_v50, %v3198_v28  ;;  %v1582_v53 = vrot.slane %v1575_v41, 4  ;;  %v1576_v24 = vrot.slane %v1559_v40, 4  ;;  %v1581_v59 = vsel %vm256_vm12, 0.0, %v1580_v52 }
 0x9a8   :  { %v1578_v55 = vrot.slane %v1563_v51, 4  ;;  %v1583_v10 = vsel %vm256_vm12, 0.0, %v1582_v53  ;;  %v1595_v12 = vsel %vm256_vm12, %v1582_v53, %v1571_v47  ;;  %v1577_v63 = vsel %vm256_vm12, 0.0, %v1576_v24 }
 0x9a9   :  { %v1600_v56 = vrot.slane %v1583_v10, 4  ;;  %v1599_v57 = vperm.slane %v1595_v12, %v3192_v18 }
 0x9aa   :  { %v1579_v58 = vsel %vm256_vm12, 0.0, %v1578_v55  ;;  %v1584_v60 = vsel %vm256_vm12, %v1578_v55, %v1559_v40 }
 0x9ab   :  { %v1589_v61 = vrot.slane %v1579_v58, 4  ;;  %v1588_v62 = vperm.slane %v1584_v60, %v3192_v18  ;;  %v1601_v16 = vsel %vm256_vm12, %v1600_v56, %v1581_v59  ;;  %v1620_v0 = vrot.slane %v1599_v57, 4  ;;  %v2973_v59 = vld [vmem:[%s4037_s1] sm:$0xff] }
 0x9ac   :  { %v1605_v17 = vperm.slane %v1601_v16, %v3192_v18  ;;  %v1790_v60 = vmul.f32 %v2973_v59, %v3686_v15 }
 0x9ad   :  { %v1590_v1 = vsel %vm256_vm12, %v1589_v61, %v1577_v63  ;;  %v1608_v3 = vrot.slane %v1588_v62, 4  ;;  %v2974_v61 = vld [vmem:[%s4038_s2] sm:$0xff] }
 0x9ae   :  { %v1594_v4 = vperm.slane %v1590_v1, %v3192_v18  ;;  %v1618_v7 = vrot.slane %v1605_v17, 4  ;;  %v1621_v5 = vsel %vm256_vm12, %v1605_v17, %v1620_v0 }
 0x9af   :  { %v1629_v27 = vperm.slane %v1621_v5, %v3198_v28 }
 0x9b0   :  { %v1609_v9 = vsel %vm256_vm12, %v1594_v4, %v1608_v3  ;;  %v1606_v8 = vrot.slane %v1594_v4, 4  ;;  %v1619_v11 = vsel %vm256_vm12, %v1618_v7, %v1599_v57 }
 0x9b1   :  { %v1617_v23 = vperm.slane %v1609_v9, %v3198_v28  ;;  %v1625_v21 = vperm.slane %v1619_v11, %v3198_v28  ;;  %v1634_v34 = vrot.slane %v1629_v27, 4 }
 0x9b2   :  { %v1607_v26 = vsel %vm256_vm12, %v1606_v8, %v1588_v62  ;;  %v1793_v8 = vmul.f32 %v2973_v59, %v3689_v20 }
 0x9b3   :  { %v1636_v29 = vrot.slane %v1617_v23, 4  ;;  %v1613_v30 = vperm.slane %v1607_v26, %v3198_v28  ;;  %v1630_v32 = vrot.slane %v1625_v21, 4  ;;  %v1635_v35 = vsel %vm256_vm12, %v1634_v34, %v1617_v23 }
 0x9b5   :  { %v1637_v33 = vsel %vm256_vm12, %v1629_v27, %v1636_v29  ;;  %v1631_v19 = vsel %vm256_vm12, %v1630_v32, %v1613_v30  ;;  %v1632_v13 = vrot.slane %v1613_v30, 4 }
 0x9b6   :  { %1812 = vrot.lane.b32.xlu2 %v1637_v33, %s2998_s29  ;;  %1806 = vrot.lane.b32.xlu1 %v1631_v19, %s2998_s29  ;;  %v1837_v47 = vmul.f32 %v2972_v46, %v1637_v33  ;;  %v1834_v50 = vmul.f32 %v2972_v46, %v1631_v19 }
 0x9b7   :  { %1824 = vrot.lane.b32.xlu0 %v1637_v33, %s2999_s30  ;;  %v1633_v36 = vsel %vm256_vm12, %v1625_v21, %v1632_v13  ;;  %v1836_v21 = vmul.f32 %v2972_v46, %v1635_v35 }
 0x9b8   :  { %v1835_v63 = vmul.f32 %v2972_v46, %v1633_v36 }
 0x9bb   :  { %v1763_v38 = vpop.permute.xlu0 %1762 }
 0x9be   :  { %1818 = vrot.lane.b32.xlu1 %v1631_v19, %s2999_s30  ;;  %1780 = vrot.lane.b32.xlu2 %v3689_v20, %s2999_s30 }
 0x9bf   :  { %1810 = vrot.lane.b32.xlu0 %v1635_v35, %s2998_s29 }
 0x9c6   :  { %1808 = vrot.lane.b32.xlu2 %v1633_v36, %s2998_s29  ;;  %1774 = vrot.lane.b32.xlu1 %v3686_v15, %s2999_s30 }
 0x9c7   :  { %1820 = vrot.lane.b32.xlu0 %v1633_v36, %s2999_s30 }
 0x9ce   :  { %1778 = vrot.lane.b32.xlu2 %v3683_v14, %s2999_s30  ;;  %1768 = vrot.lane.b32.xlu1 %v3689_v20, %s2998_s29  ;;  %v1792_v20 = vmul.f32 %v2973_v59, %v3683_v14 }
 0x9cf   :  { %1764 = vrot.lane.b32.xlu0 %v3694_v25, %s2998_s29 }
 0x9d6   :  { %1822 = vrot.lane.b32.xlu1 %v1635_v35, %s2999_s30 }
 0x9de   :  { %1766 = vrot.lane.b32.xlu1 %v3683_v14, %s2998_s29  ;;  %v2975_v14 = vld [vmem:[%s4041_s5] sm:$0xff] }
 0x9e6   :  { %1776 = vrot.lane.b32.xlu1 %v3694_v25, %s2999_s30 }
 0xa10   :  { %v1813_v39 = vpop.permute.xlu2 %1812 }
 0xa18   :  { %v1781_v48 = vpop.permute.xlu2 %1780 }
 0xa20   :  { %v1809_v12 = vpop.permute.xlu2 %1808 }
 0xa28   :  { %v1807_v22 = vpop.permute.xlu1 %1806  ;;  %v1779_v33 = vpop.permute.xlu2 %1778 }
 0xa29   :  { %v1825_v42 = vpop.permute.xlu0 %1824 }
 0xa2a   :  { %v1833_v43 = vsel %vm636_vm13, %v1813_v39, %v1825_v42 }
 0xa2b   :  { %v1841_v45 = vmul.f32 %v2971_v44, %v1833_v43  ;;  %v1791_v43 = vmul.f32 %v2973_v59, %v3694_v25 }
 0xa2d   :  { %v1845_v37 = vadd.f32 %v1841_v45, %v1837_v47 }
 0xa2f   :  { %v1853_v53 = vpack.c.bf16 %v1845_v37, %v1845_v37 }
 0xa30   :  { %v1819_v49 = vpop.permute.xlu1 %1818 }
 0xa31   :  { %v1830_v40 = vsel %vm636_vm13, %v1807_v22, %v1819_v49  ;;  %v1811_v41 = vpop.permute.xlu0 %1810  ;;  %v1915_v58 = vsel %vm705_vm14, %v1853_v53, 0 }
 0xa32   :  { %v1838_v51 = vmul.f32 %v2971_v44, %v1830_v40 }
 0xa34   :  { %v1842_v52 = vadd.f32 %v1838_v51, %v1834_v50 }
 0xa36   :  { %v1850_v24 = vpack.c.bf16 %v1842_v52, %v1842_v52 }
 0xa38   :  { %v1775_v55 = vpop.permute.xlu1 %1774  ;;  %v1858_v10 = vsel %vm705_vm14, %v1850_v24, 0 }
 0xa39   :  { %v1786_v56 = vsel %vm636_vm13, %v1763_v38, %v1775_v55  ;;  %v1821_v57 = vpop.permute.xlu0 %1820  ;;  %1867 = vmatpush.bf16.xpose.msrb.mxu2 %v1858_v10 }
 0xa3a   :  { %v1794_v62 = vmul.f32 %v2974_v61, %v1786_v56  ;;  %v1831_v16 = vsel %vm636_vm13, %v1809_v12, %v1821_v57  ;;  %v1324_v12 = vperm.slane %v3634_v2, 1 }
 0xa3b   :  { %v1839_v17 = vmul.f32 %v2971_v44, %v1831_v16 }
 0xa3c   :  { %v1798_v0 = vadd.f32 %v1794_v62, %v1790_v60 }
 0xa3d   :  { %v1843_v1 = vadd.f32 %v1839_v17, %v1835_v63 }
 0xa3e   :  { %v1846_v3 = vpack.c.bf16 %v1798_v0, %v1798_v0 }
 0xa3f   :  { %v1851_v4 = vpack.c.bf16 %v1843_v1, %v1843_v1 }
 0xa40   :  { %v1769_v7 = vpop.permute.xlu1 %1768  ;;  %2699 = vmatmul.msk.bf16.vlgmr.msrb.gmra.mxu2 %vm705_vm14, %v1846_v3 }
 0xa41   :  { %1924 = vmatpush.bf16.xpose.msra.mxu2 %v1915_v58  ;;  %v1877_v9 = vsel %vm705_vm14, %v1851_v4, 0  ;;  %v1789_v15 = vsel %vm636_vm13, %v1769_v7, %v1781_v48  ;;  %v1765_v35 = vpop.permute.xlu0 %1764  ;;  %v1393_v58 = vadd.f32 %v3637_v6, %v1324_v12 }
 0xa42   :  { %1886 = vmatpush.bf16.xpose.msrb.mxu0 %v1877_v9  ;;  %v1797_v5 = vmul.f32 %v2974_v61, %v1789_v15 }
 0xa44   :  { %v1801_v26 = vadd.f32 %v1797_v5, %v1793_v8 }
 0xa46   :  { %v1849_v30 = vpack.c.bf16 %v1801_v26, %v1801_v26 }
 0xa48   :  { %v1823_v11 = vpop.permute.xlu1 %1822 }
 0xa49   :  { %v1832_v23 = vsel %vm636_vm13, %v1811_v41, %v1823_v11  ;;  %v1650_v11 = vrot.slane %v1393_v58, 4 }
 0xa4a   :  { %v1840_v27 = vmul.f32 %v2971_v44, %v1832_v23 }
 0xa4c   :  { %v1844_v29 = vadd.f32 %v1840_v27, %v1836_v21 }
 0xa4e   :  { %v1852_v32 = vpack.c.bf16 %v1844_v29, %v1844_v29 }
 0xa50   :  { %v1767_v19 = vpop.permute.xlu1 %1766  ;;  %2702 = vmatmul.msk.bf16.vlgmr.msra.gmra.mxu2 %vm705_vm14, %v1849_v30  ;;  %v1896_v34 = vsel %vm705_vm14, %v1852_v32, 0 }
 0xa51   :  { %v1788_v13 = vsel %vm636_vm13, %v1767_v19, %v1779_v33  ;;  %1905 = vmatpush.bf16.xpose.msra.mxu1 %v1896_v34 }
 0xa52   :  { %v1796_v36 = vmul.f32 %v2974_v61, %v1788_v13 }
 0xa54   :  { %v1800_v38 = vadd.f32 %v1796_v36, %v1792_v20 }
 0xa56   :  { %v1848_v39 = vpack.c.bf16 %v1800_v38, %v1800_v38 }
 0xa58   :  { %v1777_v22 = vpop.permute.xlu1 %1776  ;;  %2701 = vmatmul.msk.bf16.vlgmr.msra.gmra.mxu1 %vm705_vm14, %v1848_v39 }
 0xa59   :  { %v1787_v42 = vsel %vm636_vm13, %v1765_v35, %v1777_v22 }
 0xa5a   :  { %v1795_v44 = vmul.f32 %v2974_v61, %v1787_v42 }
 0xa5c   :  { %v1799_v45 = vadd.f32 %v1795_v44, %v1791_v43 }
 0xa5e   :  { %v1847_v46 = vpack.c.bf16 %v1799_v45, %v1799_v45 }
 0xa60   :  { %2700 = vmatmul.msk.bf16.vlgmr.msrb.gmra.mxu0 %vm705_vm14, %v1847_v46 }
 0xac3   :  { %v1869_v47 = vpop.f32.mrf.mxu2 }
 0xac4   :  { %v1870_v10 = vadd.f32 %v2975_v14, %v1869_v47 }
 0xac6   :  { %v1930_v57 = vsel %vm636_vm13, %v1870_v10, -inf }
 0xacb   :  { %v1871_v48 = vpop.f32.mrf.mxu2 }
 0xad3   :  { %v1926_v49 = vpop.f32.mrf.mxu2 }
 0xad4   :  { %v1927_v37 = vadd.f32 %v2975_v14, %v1926_v49 }
 0xad5   :  { %v1907_v40 = vpop.f32.mrf.mxu1 }
 0xad6   :  { %v1908_v41 = vadd.f32 %v2975_v14, %v1907_v40  ;;  %v1939_v50 = vsel %vm636_vm13, %v1927_v37, -inf }
 0xad7   :  { %1940 = vmax.xlane.f32.xlu0 %v1939_v50 }
 0xad8   :  { %v1936_v25 = vsel %vm636_vm13, %v1908_v41, -inf }
 0xad9   :  { %1937 = vmax.xlane.f32.xlu1 %v1936_v25 }
 0xadb   :  { %v1928_v51 = vpop.f32.mrf.mxu2 }
 0xadd   :  { %v1888_v52 = vpop.f32.mrf.mxu0  ;;  %v1909_v53 = vpop.f32.mrf.mxu1 }
 0xade   :  { %v1889_v24 = vadd.f32 %v2975_v14, %v1888_v52 }
 0xae0   :  { %v1933_v55 = vsel %vm636_vm13, %v1889_v24, -inf }
 0xae1   :  { %1934 = vmax.xlane.f32.xlu2 %v1933_v55 }
 0xae5   :  { %v1890_v56 = vpop.f32.mrf.mxu0 }
 0xae9   :  { %1931 = vmax.xlane.f32.xlu2 %v1930_v57 }
 0xaeb   :  { %1639 = vrot.lane.b32.xlu0 %v1393_v58, %s2995_s11 }
 0xaf2   :  { %1642 = vrot.lane.b32.xlu1 %v1393_v58, %s2994_s15 }
 0xb01   :  { %1645 = vrot.lane.b32.xlu2 %v1393_v58, %s2993_s14  ;;  %s4065_s14 = sld [smem:[#allocation9_spill]] }
 0xb4a   :  { %v1941_v59 = vpop.xlane.xlu0 %1940 }
 0xb4b   :  { %v1945_v60 = vsub.f32 %v1927_v37, %v1941_v59 }
 0xb4c   :  { %v1938_v61 = vpop.xlane.xlu1 %1937 }
 0xb4d   :  { %v1952_v62 = vmul.f32 1.442695, %v1945_v60  ;;  %v1944_v16 = vsub.f32 %v1908_v41, %v1938_v61 }
 0xb4f   :  { %2947 = vpow2.f32 %v1952_v62  ;;  %v1950_v63 = vmul.f32 1.442695, %v1944_v16 }
 0xb51   :  { %2949 = vpow2.f32 %v1950_v63 }
 0xb54   :  { %v1935_v2 = vpop.xlane.xlu2 %1934 }
 0xb55   :  { %v3802_v17 = vpop.eup %2947  ;;  %v1943_v7 = vsub.f32 %v1889_v24, %v1935_v2 }
 0xb56   :  { %v1963_v6 = vsel %vm636_vm13, %v3802_v17, 0.0 }
 0xb57   :  { %v3806_v0 = vpop.eup %2949  ;;  %1964 = vadd.xlane.f32.xlu1 %v1963_v6  ;;  %v1948_v5 = vmul.f32 1.442695, %v1943_v7 }
 0xb58   :  { %v1960_v1 = vsel %vm636_vm13, %v3806_v0, 0.0 }
 0xb59   :  { %1961 = vadd.xlane.f32.xlu2 %v1960_v1 }
 0xb5c   :  { %v1932_v3 = vpop.xlane.xlu2 %1931 }
 0xb5d   :  { %v1942_v4 = vsub.f32 %v1870_v10, %v1932_v3  ;;  %v1640_v15 = vpop.permute.xlu0 %1639 }
 0xb5e   :  { %v1662_v8 = vrot.slane %v1640_v15, 4 }
 0xb5f   :  { %v1946_v9 = vmul.f32 1.442695, %v1942_v4 }
 0xb61   :  { %2951 = vpow2.f32 %v1946_v9 }
 0xb62   :  { %2953 = vpow2.f32 %v1948_v5 }
 0xb64   :  { %v1643_v23 = vpop.permute.xlu1 %1642  ;;  %v1646_v21 = vpop.permute.xlu2 %1645 }
 0xb65   :  { %v1648_v26 = vrot.slane %v1643_v23, 4  ;;  %v1651_v27 = vsel %vm256_vm12, %v1643_v23, %v1650_v11  ;;  %v1660_v29 = vrot.slane %v1646_v21, 4  ;;  %v1663_v30 = vsel %vm256_vm12, %v1646_v21, %v1662_v8 }
 0xb66   :  { %v1659_v32 = vperm.slane %v1651_v27, %v3192_v18  ;;  %v1671_v33 = vperm.slane %v1663_v30, %v3192_v18 }
 0xb67   :  { %v3814_v19 = vpop.eup %2951  ;;  %v1649_v34 = vsel %vm256_vm12, %v1648_v26, %v1393_v58  ;;  %v1661_v13 = vsel %vm256_vm12, %v1660_v29, %v1640_v15 }
 0xb68   :  { %v1655_v20 = vperm.slane %v1649_v34, %v3192_v18  ;;  %v1686_v36 = vrot.slane %v1659_v32, 4  ;;  %v1667_v38 = vperm.slane %v1661_v13, %v3192_v18  ;;  %v1684_v39 = vrot.slane %v1671_v33, 4  ;;  %v3828_v49 = vpop.eup %2953 }
 0xb69   :  { %v1954_v35 = vsel %vm636_vm13, %v3814_v19, 0.0  ;;  %v1957_v24 = vsel %vm636_vm13, %v3828_v49, 0.0 }
 0xb6a   :  { %v1674_v22 = vrot.slane %v1655_v20, 4  ;;  %v1672_v42 = vrot.slane %v1667_v38, 4  ;;  %v1685_v43 = vsel %vm256_vm12, %v1684_v39, %v1659_v32  ;;  %v1687_v44 = vsel %vm256_vm12, %v1671_v33, %v1686_v36  ;;  %1955 = vadd.xlane.f32.xlu0 %v1954_v35 }
 0xb6b   :  { %v1691_v45 = vperm.slane %v1685_v43, %v3198_v28  ;;  %v1695_v46 = vperm.slane %v1687_v44, %v3198_v28 }
 0xb6c   :  { %v1673_v47 = vsel %vm256_vm12, %v1672_v42, %v1655_v20  ;;  %v1675_v48 = vsel %vm256_vm12, %v1667_v38, %v1674_v22 }
 0xb6d   :  { %v1679_v14 = vperm.slane %v1673_v47, %v3198_v28  ;;  %v1683_v37 = vperm.slane %v1675_v48, %v3198_v28  ;;  %v1700_v40 = vrot.slane %v1691_v45, 4  ;;  %v1702_v41 = vrot.slane %v1695_v46, 4 }
 0xb6f   :  { %v1696_v50 = vrot.slane %v1679_v14, 4  ;;  %v1698_v25 = vrot.slane %v1683_v37, 4  ;;  %v1703_v51 = vsel %vm256_vm12, 0.0, %v1702_v41  ;;  %v1715_v52 = vsel %vm256_vm12, %v1702_v41, %v1691_v45 }
 0xb70   :  { %v1720_v53 = vrot.slane %v1703_v51, 4  ;;  %v1701_v10 = vsel %vm256_vm12, 0.0, %v1700_v40  ;;  %v1719_v56 = vperm.slane %v1715_v52, %v3192_v18 }
 0xb71   :  { %v1699_v55 = vsel %vm256_vm12, 0.0, %v1698_v25  ;;  %v1704_v12 = vsel %vm256_vm12, %v1698_v25, %v1679_v14  ;;  %v1697_v60 = vsel %vm256_vm12, 0.0, %v1696_v50 }
 0xb72   :  { %v1709_v57 = vrot.slane %v1699_v55, 4  ;;  %v1721_v58 = vsel %vm256_vm12, %v1720_v53, %v1701_v10  ;;  %1958 = vadd.xlane.f32.xlu0 %v1957_v24  ;;  %v1708_v59 = vperm.slane %v1704_v12, %v3192_v18  ;;  %v1740_v62 = vrot.slane %v1719_v56, 4 }
 0xb73   :  { %v1725_v61 = vperm.slane %v1721_v58, %v3192_v18 }
 0xb74   :  { %v1710_v16 = vsel %vm256_vm12, %v1709_v57, %v1697_v60  ;;  %v1728_v63 = vrot.slane %v1708_v59, 4 }
 0xb75   :  { %v1714_v2 = vperm.slane %v1710_v16, %v3192_v18  ;;  %v1741_v6 = vsel %vm256_vm12, %v1725_v61, %v1740_v62  ;;  %v1738_v1 = vrot.slane %v1725_v61, 4 }
 0xb76   :  { %v1749_v3 = vperm.slane %v1741_v6, %v3198_v28 }
 0xb77   :  { %v1729_v4 = vsel %vm256_vm12, %v1714_v2, %v1728_v63  ;;  %v1726_v7 = vrot.slane %v1714_v2, 4  ;;  %v1739_v9 = vsel %vm256_vm12, %v1738_v1, %v1719_v56 }
 0xb78   :  { %v1737_v15 = vperm.slane %v1729_v4, %v3198_v28  ;;  %v1754_v5 = vrot.slane %v1749_v3, 4  ;;  %v1745_v8 = vperm.slane %v1739_v9, %v3198_v28 }
 0xb79   :  { %v1727_v11 = vsel %vm256_vm12, %v1726_v7, %v1708_v59 }
 0xb7a   :  { %v1755_v23 = vsel %vm256_vm12, %v1754_v5, %v1737_v15  ;;  %v1733_v21 = vperm.slane %v1727_v11, %v3198_v28  ;;  %v1750_v26 = vrot.slane %v1745_v8, 4  ;;  %v1756_v27 = vrot.slane %v1737_v15, 4 }
 0xb7b   :  { %v1980_v29 = vpack.c.bf16 %v1755_v23, %v1755_v23 }
 0xb7c   :  { %v1751_v30 = vsel %vm256_vm12, %v1750_v26, %v1733_v21  ;;  %v1757_v32 = vsel %vm256_vm12, %v1749_v3, %v1756_v27  ;;  %v1752_v33 = vrot.slane %v1733_v21, 4 }
 0xb7d   :  { %v2024_v34 = vsel %vm118_vm3, %v1980_v29, 0  ;;  %v1978_v13 = vpack.c.bf16 %v1751_v30, %v1751_v30  ;;  %v1981_v20 = vpack.c.bf16 %v1757_v32, %v1757_v32 }
 0xb7e   :  { %2033 = vmatpush.bf16.msrb.mxu1 %v2024_v34  ;;  %v1753_v36 = vsel %vm256_vm12, %v1745_v8, %v1752_v33 }
 0xb7f   :  { %v1986_v38 = vsel %vm118_vm3, %v1978_v13, 0  ;;  %v2043_v39 = vsel %vm118_vm3, %v1981_v20, 0  ;;  %v1979_v35 = vpack.c.bf16 %v1753_v36, %v1753_v36 }
 0xb80   :  { %1995 = vmatpush.bf16.msra.mxu3 %v1986_v38  ;;  %2052 = vmatpush.bf16.msrb.mxu2 %v2043_v39 }
 0xb81   :  { %v2005_v22 = vsel %vm118_vm3, %v1979_v35, 0 }
 0xb82   :  { %2014 = vmatpush.bf16.msra.mxu0 %v2005_v22 }
 0xbca   :  { %v1965_v42 = vpop.xlane.xlu1 %1964 }
 0xbcb   :  { %2955 = vrcp.f32 %v1965_v42 }
 0xbcc   :  { %v1962_v43 = vpop.xlane.xlu2 %1961 }
 0xbcd   :  { %2957 = vrcp.f32 %v1962_v43 }
 0xbd1   :  { %v2956_v44 = vpop.eup %2955 }
 0xbd2   :  { %v1973_v45 = vmul.f32 %v2956_v44, %v3802_v17 }
 0xbd3   :  { %v2958_v46 = vpop.eup %2957 }
 0xbd4   :  { %v1977_v47 = vpack.c.bf16 %v1973_v45, %v1973_v45  ;;  %v1972_v48 = vmul.f32 %v2958_v46, %v3806_v0 }
 0xbd6   :  { %v1976_v14 = vpack.c.bf16 %v1972_v48, %v1972_v48  ;;  %2706 = vmatmul.msk.bf16.vlgmr.msrb.gmra.mxu2 %vm636_vm13, %v1977_v47 }
 0xbd8   :  { %2705 = vmatmul.msk.bf16.vlgmr.msrb.gmra.mxu1 %vm636_vm13, %v1976_v14 }
 0xbdd   :  { %v1956_v37 = vpop.xlane.xlu0 %1955 }
 0xbde   :  { %2959 = vrcp.f32 %v1956_v37 }
 0xbe4   :  { %v2960_v40 = vpop.eup %2959 }
 0xbe5   :  { %v1970_v41 = vmul.f32 %v2960_v40, %v3814_v19  ;;  %v1959_v50 = vpop.xlane.xlu0 %1958 }
 0xbe6   :  { %2961 = vrcp.f32 %v1959_v50 }
 0xbe7   :  { %v1974_v25 = vpack.c.bf16 %v1970_v41, %v1970_v41 }
 0xbe9   :  { %2703 = vmatmul.msk.bf16.vlgmr.msra.gmra.mxu3 %vm636_vm13, %v1974_v25 }
 0xbec   :  { %v2962_v17 = vpop.eup %2961 }
 0xbed   :  { %v1971_v51 = vmul.f32 %v2962_v17, %v3828_v49 }
 0xbef   :  { %v1975_v52 = vpack.c.bf16 %v1971_v51, %v1971_v51 }
 0xbf1   :  { %2704 = vmatmul.msk.bf16.vlgmr.msra.gmra.mxu0 %vm636_vm13, %v1975_v52 }
 0xc55   :  { %v2035_v0 = vpop.f32.mrf.mxu1 }
 0xc56   :  { %v2058_v10 = vrot.slane %v2035_v0, 4 }
 0xc59   :  { %v2054_v53 = vpop.f32.mrf.mxu2 }
 0xc5a   :  { %v2070_v56 = vrot.slane %v2054_v53, 4 }
 0xc5d   :  { %v2037_v24 = vpop.f32.mrf.mxu1 }
 0xc61   :  { %v2056_v55 = vpop.f32.mrf.mxu2 }
 0xc6c   :  { %v1997_v12 = vpop.f32.mrf.mxu3 }
 0xc6d   :  { %v2059_v19 = vsel %vm256_vm12, %v2058_v10, %v1997_v12  ;;  %v2060_v57 = vrot.slane %v1997_v12, 4 }
 0xc6e   :  { %v2065_v58 = vperm.slane %v2059_v19, %v3192_v18  ;;  %v2016_v59 = vpop.f32.mrf.mxu0 }
 0xc6f   :  { %v2061_v60 = vsel %vm256_vm12, %v2035_v0, %v2060_v57  ;;  %v2071_v49 = vsel %vm256_vm12, %v2070_v56, %v2016_v59  ;;  %v2072_v61 = vrot.slane %v2016_v59, 4  ;;  %v2878_v59 = vld [vmem:[%s4046_s10 + $0x28] sm:$0xff] }
 0xc70   :  { %v2069_v62 = vperm.slane %v2061_v60, %v3192_v18  ;;  %v2084_v16 = vrot.slane %v2065_v58, 4  ;;  %v2077_v63 = vperm.slane %v2071_v49, %v3192_v18  ;;  %v2877_v60 = vld [vmem:[%s4046_s10 + $0x20] sm:$0xff] }
 0xc71   :  { %v2073_v2 = vsel %vm256_vm12, %v2054_v53, %v2072_v61 }
 0xc72   :  { %v2096_v6 = vrot.slane %v2069_v62, 4  ;;  %v2081_v1 = vperm.slane %v2073_v2, %v3192_v18  ;;  %v2082_v3 = vrot.slane %v2077_v63, 4  ;;  %v2085_v4 = vsel %vm256_vm12, %v2077_v63, %v2084_v16 }
 0xc73   :  { %v2093_v7 = vperm.slane %v2085_v4, %v3198_v28 }
 0xc74   :  { %v2083_v9 = vsel %vm256_vm12, %v2082_v3, %v2065_v58  ;;  %v2094_v15 = vrot.slane %v2081_v1, 4  ;;  %v2097_v5 = vsel %vm256_vm12, %v2081_v1, %v2096_v6  ;;  %v1999_v8 = vpop.f32.mrf.mxu3  ;;  %v2880_v58 = vld [vmem:[%s4046_s10 + $0x38] sm:$0xff] }
 0xc75   :  { %v2089_v11 = vperm.slane %v2083_v9, %v3198_v28  ;;  %v2105_v23 = vperm.slane %v2097_v5, %v3198_v28  ;;  %v2108_v21 = vrot.slane %v2093_v7, 4  ;;  %2224 = vmatpush.bf16.msrb.mxu3 %v2880_v58  ;;  %v2888_v5 = vld [vmem:[%s4048_s12 + $0x74] sm:$0xf0] }
 0xc76   :  { %v2095_v26 = vsel %vm256_vm12, %v2094_v15, %v2069_v62  ;;  %v2018_v27 = vpop.f32.mrf.mxu0  ;;  %v2767_v15 = vld [vmem:[%s4048_s12 + $0x70] sm:$0xf] }
 0xc77   :  { %v2101_v29 = vperm.slane %v2095_v26, %v3198_v28  ;;  %v2106_v30 = vrot.slane %v2089_v11, 4  ;;  %v2109_v32 = vsel %vm256_vm12, 0.0, %v2108_v21  ;;  %v2112_v33 = vrot.slane %v2105_v23, 4  ;;  %v2886_v26 = vld [vmem:[%s4048_s12 + $0x64] sm:$0xf0] }
 0xc78   :  { %v2114_v34 = vsel %vm256_vm12, %v2108_v21, %v2089_v11  ;;  %v2119_v13 = vrot.slane %v2109_v32, 4  ;;  %v2768_v8 = vor.u32 %v2888_v5, %v2767_v15  ;;  %v2769_v11 = vld [vmem:[%s4048_s12 + $0x78] sm:$0xf0]  ;;  %v2759_v21 = vld [vmem:[%s4048_s12 + $0x60] sm:$0xf] }
 0xc79   :  { %v2107_v20 = vsel %vm256_vm12, 0.0, %v2106_v30  ;;  %v2110_v36 = vrot.slane %v2101_v29, 4  ;;  %v2113_v38 = vsel %vm256_vm12, 0.0, %v2112_v33  ;;  %v2118_v39 = vperm.slane %v2114_v34, %v3192_v18  ;;  %v2885_v27 = vld [vmem:[%s4048_s12 + $0x64] sm:$0xf] }
 0xc7a   :  { %v2130_v35 = vrot.slane %v2113_v38, 4  ;;  %v2120_v22 = vsel %vm256_vm12, %v2119_v13, %v2107_v20  ;;  %v2125_v42 = vsel %vm256_vm12, %v2112_v33, %v2101_v29  ;;  %2314 = vmatpush.bf16.msrb.mxu0 %v2768_v8  ;;  %v2760_v29 = vor.u32 %v2886_v26, %v2759_v21  ;;  %v2761_v30 = vld [vmem:[%s4048_s12 + $0x68] sm:$0xf0]  ;;  %v2751_v33 = vld [vmem:[%s4048_s12 + $0x50] sm:$0xf] }
 0xc7b   :  { %v2111_v43 = vsel %vm256_vm12, 0.0, %v2110_v36  ;;  %v2124_v44 = vperm.slane %v2120_v22, %v3192_v18  ;;  %v2129_v45 = vperm.slane %v2125_v42, %v3192_v18  ;;  %v2138_v46 = vrot.slane %v2118_v39, 4  ;;  %v2884_v34 = vld [vmem:[%s4048_s12 + $0x54] sm:$0xf0]  ;;  %v2883_v13 = vld [vmem:[%s4048_s12 + $0x54] sm:$0xf] }
 0xc7c   :  { %v2131_v47 = vsel %vm256_vm12, %v2130_v35, %v2111_v43  ;;  %v2764_v32 = vor.u32 %v2885_v27, %v2761_v30  ;;  %v2752_v20 = vor.u32 %v2884_v34, %v2751_v33  ;;  %v2753_v36 = vld [vmem:[%s4048_s12 + $0x58] sm:$0xf0]  ;;  %v2882_v35 = vld [vmem:[%s4048_s12 + $0x44] sm:$0xf0]  ;;  %v2881_v22 = vld [vmem:[%s4048_s12 + $0x44] sm:$0xf] }
 0xc7d   :  { %v2135_v48 = vperm.slane %v2131_v47, %v3192_v18  ;;  %v2139_v14 = vsel %vm256_vm12, %v2124_v44, %v2138_v46  ;;  %v2150_v37 = vrot.slane %v2129_v45, 4  ;;  %v2136_v40 = vrot.slane %v2124_v44, 4  ;;  %v2745_v43 = vld [vmem:[%s4048_s12 + $0x48] sm:$0xf0]  ;;  %v2899_v30 = vld [vmem:[%s4065_s14 + $0x10] sm:$0xff] }
 0xc7e   :  { %v2147_v41 = vperm.slane %v2139_v14, %v3198_v28  ;;  %2315 = vmatpush.bf16.msrb.mxu0 %v2760_v29  ;;  %v2756_v38 = vor.u32 %v2883_v13, %v2753_v36  ;;  %v2748_v44 = vor.u32 %v2881_v22, %v2745_v43  ;;  %v2900_v29 = vld [vmem:[%s4065_s14 + $0x18] sm:$0xff] }
 0xc7f   :  { %v2151_v50 = vsel %vm256_vm12, %v2135_v48, %v2150_v37  ;;  %v2137_v25 = vsel %vm256_vm12, %v2136_v40, %v2118_v39  ;;  %v2148_v17 = vrot.slane %v2135_v48, 4  ;;  %v2743_v39 = vld [vmem:[%s4048_s12 + $0x40] sm:$0xf] }
 0xc80   :  { %v2159_v51 = vperm.slane %v2151_v50, %v3198_v28  ;;  %v2166_v52 = vrot.slane %v2147_v41, 4  ;;  %v2143_v0 = vperm.slane %v2137_v25, %v3198_v28  ;;  %v2744_v42 = vor.u32 %v2882_v35, %v2743_v39  ;;  %v2917_v25 = vld [vmem:[%s4063_s21 + $0x1] ss:$0 sm:$0xff] }
 0xc81   :  { %v2149_v53 = vsel %vm256_vm12, %v2148_v17, %v2129_v45 }
 0xc82   :  { %v2167_v18 = vsel %vm256_vm12, %v2159_v51, %v2166_v52  ;;  %v2164_v24 = vrot.slane %v2159_v51, 4  ;;  %v2155_v55 = vperm.slane %v2149_v53, %v3198_v28  ;;  %v2162_v10 = vrot.slane %v2143_v0, 4  ;;  %v2879_v28 = vld [vmem:[%s4046_s10 + $0x30] sm:$0xff]  ;;  %2316 = vmatpush.bf16.msrb.mxu0 %v2752_v20  ;;  %v2896_v53 = vld [vmem:[%s4064_s24 + $0x78] sm:$0xff] }
 0xc83   :  { %2177 = vrot.lane.b32.xlu0 %v2167_v18, %s3000_s17  ;;  %2225 = vmatpush.bf16.msrb.mxu3 %v2879_v28  ;;  %v2895_v18 = vld [vmem:[%s4064_s24 + $0x70] sm:$0xff] }
 0xc84   :  { %v2165_v12 = vsel %vm256_vm12, %v2164_v24, %v2147_v41  ;;  %v2160_v56 = vrot.slane %v2155_v55, 4  ;;  %v2163_v19 = vsel %vm256_vm12, %v2155_v55, %v2162_v10  ;;  %2423 = vmatpush.bf16.msra.mxu2 %v2896_v53  ;;  %v2894_v24 = vld [vmem:[%s4064_s24 + $0x68] sm:$0xff]  ;;  %v2893_v55 = vld [vmem:[%s4064_s24 + $0x60] sm:$0xff]  ;;  %v2892_v10 = vld [vmem:[%s4064_s24 + $0x58] sm:$0xff] }
 0xc85   :  { %2173 = vrot.lane.b32.xlu2 %v2165_v12, %s3001_s16  ;;  %2169 = vrot.lane.b32.xlu1 %v2163_v19, %s3002_s27  ;;  %v2891_v12 = vld [vmem:[%s4064_s24 + $0x50] sm:$0xff]  ;;  %v2889_v19 = vld [vmem:[%s4064_s24 + $0x40] sm:$0xff] }
 0xc86   :  { %v2161_v57 = vsel %vm256_vm12, %v2160_v56, %v2143_v0  ;;  %2317 = vmatpush.bf16.msrb.mxu0 %v2744_v42  ;;  %v2890_v56 = vld [vmem:[%s4064_s24 + $0x48] sm:$0xff]  ;;  %v2918_v42 = vld [vmem:[%s4066_s18] ss:$0 sm:$0xff] }
 0xc87   :  { %2226 = vmatpush.bf16.msrb.mxu3 %v2878_v59 }
 0xc88   :  { %2424 = vmatpush.bf16.msra.mxu2 %v2895_v18 }
 0xc8b   :  { %2227 = vmatpush.bf16.msrb.mxu3 %v2877_v60 }
 0xc8c   :  { %2425 = vmatpush.bf16.msra.mxu2 %v2894_v24 }
 0xc8f   :  { %2499 = vmatpush.bf16.msra.mxu3 %v2900_v29 }
 0xc90   :  { %2426 = vmatpush.bf16.msra.mxu2 %v2893_v55 }
 0xc93   :  { %2500 = vmatpush.bf16.msra.mxu3 %v2899_v30 }
 0xc94   :  { %2427 = vmatpush.bf16.msra.mxu2 %v2892_v10 }
 0xc98   :  { %2428 = vmatpush.bf16.msra.mxu2 %v2891_v12 }
 0xc9c   :  { %2429 = vmatpush.bf16.msra.mxu2 %v2890_v56 }
 0xca0   :  { %2430 = vmatpush.bf16.msra.mxu2 %v2889_v19 }
 0xcdf   :  { %v2174_v61 = vpop.permute.xlu2 %2173 }
 0xcf5   :  { %v2178_v16 = vpop.permute.xlu0 %2177 }
 0xcf7   :  { %v2170_v49 = vpop.permute.xlu1 %2169 }
 0xcf8   :  { %v2180_v62 = vsel %vm705_vm14, %v2161_v57, %v2170_v49 }
 0xcf9   :  { %v2181_v63 = vsel %vm1033_vm15, %v2180_v62, %v2174_v61 }
 0xcfa   :  { %v2182_v2 = vsel %vm1035_vm0, %v2181_v63, %v2178_v16 }
 0xcfb   :  { %v2183_v6 = vpack.c.bf16 %v2182_v2, %v2182_v2 }
 0xcfd   :  { %2731 = vmatmul.msk.bf16.vlgmr.msrb.gmra.mxu3 %vm133_vm7, %v2183_v6 }
 0xd80   :  { %v2229_v1 = vpop.f32.mrf.mxu3 }
 0xd81   :  { %v3930_v3 = vadd.f32 %v2229_v1, %v3571_v31  ;;  %v2887_v31 = vld [vmem:[%s4048_s12 + $0x74] sm:$0xf] }
 0xd82   :  { %v2772_v23 = vor.u32 %v2887_v31, %v2769_v11 }
 0xd83   :  { %v2236_v4 = vmul.f32 %v3930_v3, %v3930_v3 }
 0xd84   :  { %2327 = vmatpush.bf16.msra.mxu1 %v2772_v23 }
 0xd85   :  { %v2237_v7 = vsel %vm133_vm7, %v2236_v4, 0.0 }
 0xd86   :  { %2238 = vadd.xlane.f32.xlu0 %v2237_v7 }
 0xd88   :  { %v2231_v9 = vpop.f32.mrf.mxu3  ;;  %2328 = vmatpush.bf16.msra.mxu1 %v2764_v32  ;;  %v2898_v32 = vld [vmem:[%s4065_s14 + $0x8] sm:$0xff] }
 0xd89   :  { %2501 = vmatpush.bf16.msra.mxu3 %v2898_v32 }
 0xd8c   :  { %2329 = vmatpush.bf16.msra.mxu1 %v2756_v38 }
 0xd90   :  { %2330 = vmatpush.bf16.msra.mxu1 %v2748_v44 }
 0xdf9   :  { %v2239_v45 = vpop.xlane.xlu0 %2238 }
 0xdfa   :  { %v2240_v46 = vmul.f32 %v2239_v45, %v3169_v54 }
 0xdfc   :  { %v2241_v47 = vadd.f32 1e-06, %v2240_v46 }
 0xdfe   :  { %2963 = vrsqrt.f32 %v2241_v47  ;;  %vm2248_vm12 = vweird.f32 %v2241_v47 }
 0xe04   :  { %v2964_v48 = vpop.eup %2963 }
 0xe05   :  { %v2243_v14 = vmul.f32 %v2964_v48, %v2241_v47  ;;  %vm2249_vm3 = vweird.f32 %v2964_v48 }
 0xe06   :  { %vm2250_vm13 = vmor %vm2248_vm12, %vm2249_vm3 }
 0xe07   :  { %v2244_v37 = vmul.f32 %v2964_v48, %v2243_v14 }
 0xe09   :  { %v2245_v40 = vmul.f32 0.5, %v2244_v37 }
 0xe0b   :  { %v2246_v41 = vsub.f32 1.5, %v2245_v40 }
 0xe0d   :  { %v2247_v50 = vmul.f32 %v2964_v48, %v2246_v41 }
 0xe0f   :  { %v2251_v17 = vsel %vm2250_vm13, %v2964_v48, %v2247_v50 }
 0xe10   :  { %v2252_v51 = vmul.f32 %v2251_v17, %v3930_v3 }
 0xe12   :  { %v2256_v52 = vmul.f32 %v2917_v25, %v2252_v51 }
 0xe14   :  { %v2257_v0 = vpack.c.bf16 %v2256_v52, %v2256_v52 }
 0xe16   :  { %2773 = vmatmul.msk.bf16.vlgmr.msrb.gmra.mxu0 %vm133_vm7, %v2257_v0  ;;  %2774 = vmatmul.msk.bf16.vlgmr.msra.gmra.mxu1 %vm133_vm7, %v2257_v0 }
 0xe93   :  { %v2319_v57 = vpop.f32.mrf.mxu0  ;;  %v2332_v58 = vpop.f32.mrf.mxu1 }
 0xe94   :  { %v2775_v28 = vmul.f32 -1.442695, %v2319_v57 }
 0xe96   :  { %2965 = vpow2.f32 %v2775_v28 }
 0xe9b   :  { %v2321_v59 = vpop.f32.mrf.mxu0  ;;  %v2334_v60 = vpop.f32.mrf.mxu1 }
 0xe9c   :  { %v2966_v49 = vpop.eup %2965 }
 0xe9d   :  { %v2339_v61 = vadd.f32 1.0, %v2966_v49 }
 0xe9f   :  { %2967 = vrcp.f32 %v2339_v61  ;;  %v2351_v2 = vand.u32 2147483648, %v2339_v61  ;;  %v2349_v1 = vand.u32 2147483647, %v2339_v61  ;;  %vm2345_vm15 = vweird.f32 %v2339_v61 }
 0xea1   :  { %v2352_v7 = vor.u32 1.1754944e-38, %v2351_v2  ;;  %vm2350_vm2 = vcmp.eq.f32.partialorder %v2349_v1, 8.507059e+37 }
 0xea5   :  { %v2968_v62 = vpop.eup %2967 }
 0xea6   :  { %v2341_v16 = vmul.f32 %v2968_v62, %v2339_v61  ;;  %vm2346_vm14 = vweird.f32 %v2968_v62 }
 0xea7   :  { %vm2347_vm0 = vmor %vm2345_vm15, %vm2346_vm14 }
 0xea8   :  { %v2342_v63 = vsub.f32 1.0, %v2341_v16 }
 0xeaa   :  { %v2343_v6 = vmul.f32 %v2968_v62, %v2342_v63 }
 0xeac   :  { %v2344_v4 = vadd.f32 %v2968_v62, %v2343_v6 }
 0xeae   :  { %v2348_v9 = vsel %vm2347_vm0, %v2968_v62, %v2344_v4 }
 0xeaf   :  { %v2353_v15 = vsel %vm2350_vm2, %v2352_v7, %v2348_v9 }
 0xeb0   :  { %v2355_v5 = vmul.f32 %v2353_v15, %v2319_v57 }
 0xeb2   :  { %v2356_v31 = vmul.f32 %v2355_v5, %v2332_v58 }
 0xeb4   :  { %v2357_v8 = vpack.c.bf16 %v2356_v31, %v2356_v31 }
 0xeb6   :  { %2431 = vmatmul.bf16.vlgmr.msra.gmra.mxu2 %v2357_v8 }
 0xf39   :  { %v2432_v11 = vpop.f32.mrf.mxu2 }
 0xf3a   :  { %v2436_v23 = vadd.f32 %v2432_v11, %v3930_v3  ;;  %v2897_v3 = vld [vmem:[%s4065_s14] sm:$0xff] }
 0xf3b   :  { %2502 = vmatpush.bf16.msra.mxu3 %v2897_v3 }
 0xf3c   :  { %v2438_v21 = vmul.f32 %v2436_v23, %v2436_v23 }
 0xf3e   :  { %v2439_v26 = vsel %vm133_vm7, %v2438_v21, 0.0 }
 0xf3f   :  { %2440 = vadd.xlane.f32.xlu1 %v2439_v26 }
 0xf41   :  { %v2434_v27 = vpop.f32.mrf.mxu2 }
 0xfb2   :  { %v2441_v33 = vpop.xlane.xlu1 %2440 }
 0xfb3   :  { %v2442_v34 = vmul.f32 %v2441_v33, %v3169_v54 }
 0xfb5   :  { %v2443_v13 = vadd.f32 1e-06, %v2442_v34 }
 0xfb7   :  { %2969 = vrsqrt.f32 %v2443_v13  ;;  %vm2450_vm5 = vweird.f32 %v2443_v13 }
 0xfbd   :  { %v2970_v20 = vpop.eup %2969 }
 0xfbe   :  { %v2445_v36 = vmul.f32 %v2970_v20, %v2443_v13  ;;  %vm2451_vm4 = vweird.f32 %v2970_v20 }
 0xfbf   :  { %vm2452_vm6 = vmor %vm2450_vm5, %vm2451_vm4 }
 0xfc0   :  { %v2446_v38 = vmul.f32 %v2970_v20, %v2445_v36 }
 0xfc2   :  { %v2447_v39 = vmul.f32 0.5, %v2446_v38 }
 0xfc4   :  { %v2448_v35 = vsub.f32 1.5, %v2447_v39 }
 0xfc6   :  { %v2449_v22 = vmul.f32 %v2970_v20, %v2448_v35 }
 0xfc8   :  { %v2453_v43 = vsel %vm2452_vm6, %v2970_v20, %v2449_v22 }
 0xfc9   :  { %v2454_v44 = vmul.f32 %v2453_v43, %v2436_v23 }
 0xfcb   :  { %v2458_v45 = vmul.f32 %v2918_v42, %v2454_v44 }
 0xfcd   :  { %v2459_v46 = vpack.c.bf16 %v2458_v45, %v2458_v45 }
 0xfcf   :  { %2840 = vmatmul.msk.bf16.vlgmr.msra.gmra.mxu3 %vm133_vm7, %v2459_v46 }
0x1052   :  { %v2504_v54 = vpop.f32.mrf.mxu3 }
0x1053   :  { %2508 = vst [vmem:[%s4067_s0] sm:$0xff] %v2504_v54 }
0x105a   :  { %v2506_v47 = vpop.f32.mrf.mxu3 }
0x105b   :  { %2513 = vsyncpa [#allocation3], 1 }

</bundles_post_ra>
